<compile_context>
chip_gen: v7x
topology: tpu7x:2x2x1
jax: 0.10.0
libtpu: 0.0.40
codegen_flags: <defaults>
</compile_context>

<pallas_src>
import jax
import jax.numpy as jnp
from jax.experimental import pallas as pl
from jax.experimental.pallas import tpu as pltpu


def _round_up(x, m):
    return (x + m - 1) // m * m


def _pick_row_tile(hw):
    """Largest preferred HW row-tile that divides HW (8 images/block -> up to 4096 rows/step)."""
    for tm in (512, 256, 128, 64, 32, 16, 8):
        if hw % tm == 0:
            return tm
    return hw  # fall back to full extent (allowed: block dim == array dim)


def _make_network_v1_kernel(NB, TM, KP, CFP, HW):
    """Fused conv(head) + streamed avg-pool + fc(tail) kernel."""
    inv_hw = 1.0 / float(HW)

    def kernel(patches_ref, wc_ref, bc_ref,
               w1_ref, b1_ref, w2_ref, b2_ref, w3_ref, b3_ref,
               out_ref, pooled_acc):
        t = pl.program_id(1)

        # ---- init the per-image pooled accumulator at the first HW tile of this image group
        @pl.when(t == 0)
        def _init():
            pooled_acc[...] = jnp.zeros_like(pooled_acc)

        # ---- "head": conv3x3 as ONE fused im2col matmul over the whole 8-image block
        #      (bf16 operands -> f32 accum), bias + ReLU on the VPU, then a per-image
        #      sublane reduce streams AdaptiveAvgPool2d(1) into the accumulator.
        p = patches_ref[...].reshape(NB * TM, KP)            # layout-preserving collapse
        conv = jnp.dot(p, wc_ref[...],                       # (NB*TM, KP) x (KP, CFP)
                       preferred_element_type=jnp.float32)
        conv = jnp.maximum(conv + bc_ref[...], 0.0)
        pooled_acc[...] += conv.reshape(NB, TM, CFP).sum(axis=1)   # (NB, CFP)

        # ---- tail on the last HW tile: finish the mean, then base.fc
        #      (Dropout layers are identity at inference time).
        @pl.when(t == pl.num_programs(1) - 1)
        def _finalize():
            pooled = pooled_acc[...] * inv_hw                # mean over H*W
            h1 = jnp.maximum(
                jnp.dot(pooled.astype(jnp.bfloat16), w1_ref[...],
                        preferred_element_type=jnp.float32) + b1_ref[...], 0.0)
            h2 = jnp.maximum(
                jnp.dot(h1.astype(jnp.bfloat16), w2_ref[...],
                        preferred_element_type=jnp.float32) + b2_ref[...], 0.0)
            out_ref[...] = (
                jnp.dot(h2.astype(jnp.bfloat16), w3_ref[...],
                        preferred_element_type=jnp.float32) + b3_ref[...])

    return kernel


def network_v1_forward(x_nchw, params):
    """Forward pass of NetworkV1 (inference). x_nchw: [N, Cin, H, W] float32."""
    N, Cin, H, W = x_nchw.shape
    HW = H * W

    # NCHW -> NHWC (glue)
    x = jnp.transpose(x_nchw, (0, 2, 3, 1))
    # 3x3 "same" padding im2col (glue): patch layout index = (dy*3 + dx)*Cin + cin
    xp = jnp.pad(x, ((0, 0), (1, 1), (1, 1), (0, 0)))
    cols = [xp[:, dy:dy + H, dx:dx + W, :] for dy in range(3) for dx in range(3)]
    patches = jnp.concatenate(cols, axis=-1).reshape(N, HW, 9 * Cin)

    # ---- MXU-friendly padding of all contraction / lane dims to multiples of 128
    K = 9 * Cin
    KP = _round_up(K, 128)
    wconv = params["wconv"].reshape(K, -1)        # [(dy,dx,cin), Cfeat] matches patch layout
    Cfeat = wconv.shape[1]
    CFP = _round_up(Cfeat, 128)
    H1 = params["w1"].shape[1]
    H2 = params["w2"].shape[1]
    H1P = _round_up(H1, 128)
    H2P = _round_up(H2, 128)
    num_classes = params["w3"].shape[1]
    COP = _round_up(num_classes, 128)

    NB = 8                                        # images per block (>= 8 sublanes for FC)
    NP = _round_up(N, NB)
    TM = _pick_row_tile(HW)
    grid = (NP // NB, HW // TM)

    # ---- padded / bf16 operands (bias + elementwise math stays f32 inside the kernel)
    patches_p = jnp.pad(patches, ((0, NP - N), (0, 0), (0, KP - K))).astype(jnp.bfloat16)
    wconv_p = jnp.pad(wconv, ((0, KP - K), (0, CFP - Cfeat))).astype(jnp.bfloat16)
    bconv_p = jnp.pad(params["bconv"], (0, CFP - Cfeat))[None, :].astype(jnp.float32)
    w1_p = jnp.pad(params["w1"], ((0, CFP - Cfeat), (0, H1P - H1))).astype(jnp.bfloat16)
    b1_p = jnp.pad(params["b1"], (0, H1P - H1))[None, :].astype(jnp.float32)
    w2_p = jnp.pad(params["w2"], ((0, H1P - H1), (0, H2P - H2))).astype(jnp.bfloat16)
    b2_p = jnp.pad(params["b2"], (0, H2P - H2))[None, :].astype(jnp.float32)
    w3_p = jnp.pad(params["w3"], ((0, H2P - H2), (0, COP - num_classes))).astype(jnp.bfloat16)
    b3_p = jnp.pad(params["b3"], (0, COP - num_classes))[None, :].astype(jnp.float32)

    kernel = _make_network_v1_kernel(NB, TM, KP, CFP, HW)

    # Advisory cost estimate for the XLA scheduler.
    flops = (2 * NP * HW * KP * CFP
             + 2 * NP * (CFP * H1P + H1P * H2P + H2P * COP))
    bytes_accessed = (patches_p.size * 2
                      + (wconv_p.size + w1_p.size + w2_p.size + w3_p.size) * 2
                      + (bconv_p.size + b1_p.size + b2_p.size + b3_p.size) * 4
                      + NP * COP * 4)
    cost = pl.CostEstimate(flops=flops, transcendentals=0, bytes_accessed=bytes_accessed)

    out_pad = pl.pallas_call(
        kernel,
        out_shape=jax.ShapeDtypeStruct((NP, COP), jnp.float32),
        grid_spec=pltpu.PrefetchScalarGridSpec(
            num_scalar_prefetch=0,
            grid=grid,
            in_specs=[
                pl.BlockSpec((NB, TM, KP), lambda b, t: (b, t, 0)),   # patch row tiles
                pl.BlockSpec((KP, CFP), lambda b, t: (0, 0)),         # conv weight
                pl.BlockSpec((1, CFP), lambda b, t: (0, 0)),          # conv bias
                pl.BlockSpec((CFP, H1P), lambda b, t: (0, 0)),        # fc1 w
                pl.BlockSpec((1, H1P), lambda b, t: (0, 0)),          # fc1 b
                pl.BlockSpec((H1P, H2P), lambda b, t: (0, 0)),        # fc2 w
                pl.BlockSpec((1, H2P), lambda b, t: (0, 0)),          # fc2 b
                pl.BlockSpec((H2P, COP), lambda b, t: (0, 0)),        # fc3 w
                pl.BlockSpec((1, COP), lambda b, t: (0, 0)),          # fc3 b
            ],
            out_specs=pl.BlockSpec((NB, COP), lambda b, t: (b, 0)),
            scratch_shapes=[pltpu.VMEM((NB, CFP), jnp.float32)],       # pooled-sum accumulator
        ),
        compiler_params=pltpu.CompilerParams(
            dimension_semantics=("parallel", "arbitrary"),
            vmem_limit_bytes=32 * 1024 * 1024,
        ),
        cost_estimate=cost,
    )(patches_p, wconv_p, bconv_p, w1_p, b1_p, w2_p, b2_p, w3_p, b3_p)

    return out_pad[:N, :num_classes]


def init_params(key, Cin, Cfeat, num_classes):
    """Deterministic synthetic parameter init (shapes follow NetworkV1.__init__)."""
    ks = jax.random.split(key, 8)
    return {
        # stand-in feature-extractor conv of `base` (head)
        "wconv": jax.random.normal(ks[0], (3, 3, Cin, Cfeat), jnp.float32) * 0.1,
        "bconv": jax.random.normal(ks[1], (Cfeat,), jnp.float32) * 0.01,
        # base.fc replacement: Linear(in_features, 512) / Linear(512, 256) / Linear(256, C)
        "w1": jax.random.normal(ks[2], (Cfeat, 512), jnp.float32) * (1.0 / float(Cfeat) ** 0.5),
        "b1": jax.random.normal(ks[3], (512,), jnp.float32) * 0.01,
        "w2": jax.random.normal(ks[4], (512, 256), jnp.float32) * (1.0 / 512.0 ** 0.5),
        "b2": jax.random.normal(ks[5], (256,), jnp.float32) * 0.01,
        "w3": jax.random.normal(ks[6], (256, num_classes), jnp.float32) * (1.0 / 256.0 ** 0.5),
        "b3": jax.random.normal(ks[7], (num_classes,), jnp.float32) * 0.01,
    }


if __name__ == "__main__":
    key = jax.random.PRNGKey(0)
    k_param, k_x = jax.random.split(key)

    N, Cin, H, W = 2, 4, 16, 16         # small NCHW input
    Cfeat = 32                          # in_features of base.fc in this synthetic base
    num_classes = 3

    params = init_params(k_param, Cin, Cfeat, num_classes)
    x = jax.random.normal(k_x, (N, Cin, H, W), jnp.float32)

    out = network_v1_forward(x, params)
    out = jax.block_until_ready(out)
    assert out.shape == (N, num_classes) and out.dtype == jnp.float32
    print("KERNEL_OK")
</pallas_src>

<mosaic_0001>
module attributes {stable_mosaic.version = 11 : i64} {
  func.func @kernel(%arg0: i32, %arg1: i32, %arg2: memref<8x256x128xbf16, #tpu.memory_space<vmem>>, %arg3: memref<128x128xbf16, #tpu.memory_space<vmem>>, %arg4: memref<1x128xf32, #tpu.memory_space<vmem>>, %arg5: memref<128x512xbf16, #tpu.memory_space<vmem>>, %arg6: memref<1x512xf32, #tpu.memory_space<vmem>>, %arg7: memref<512x256xbf16, #tpu.memory_space<vmem>>, %arg8: memref<1x256xf32, #tpu.memory_space<vmem>>, %arg9: memref<256x128xbf16, #tpu.memory_space<vmem>>, %arg10: memref<1x128xf32, #tpu.memory_space<vmem>>, %arg11: memref<8x128xf32, #tpu.memory_space<vmem>>, %arg12: memref<8x128xf32, #tpu.memory_space<vmem>>) attributes {dimension_semantics = [#tpu.dimension_semantics<parallel>, #tpu.dimension_semantics<arbitrary>], iteration_bounds = array<i64: 1, 1>, scalar_prefetch = 0 : i64, scratch_operands = 1 : i64, tpu.core_type = #tpu.core_type<tc>, window_params = [{transform_indices = @transform_0, window_bounds = array<i64: 8, 256, 128>}, {pipeline_mode = #tpu.pipeline_mode<synchronous>, transform_indices = @transform_1, window_bounds = array<i64: 128, 128>}, {pipeline_mode = #tpu.pipeline_mode<synchronous>, transform_indices = @transform_2, window_bounds = array<i64: 1, 128>}, {pipeline_mode = #tpu.pipeline_mode<synchronous>, transform_indices = @transform_3, window_bounds = array<i64: 128, 512>}, {pipeline_mode = #tpu.pipeline_mode<synchronous>, transform_indices = @transform_4, window_bounds = array<i64: 1, 512>}, {pipeline_mode = #tpu.pipeline_mode<synchronous>, transform_indices = @transform_5, window_bounds = array<i64: 512, 256>}, {pipeline_mode = #tpu.pipeline_mode<synchronous>, transform_indices = @transform_6, window_bounds = array<i64: 1, 256>}, {pipeline_mode = #tpu.pipeline_mode<synchronous>, transform_indices = @transform_7, window_bounds = array<i64: 256, 128>}, {pipeline_mode = #tpu.pipeline_mode<synchronous>, transform_indices = @transform_8, window_bounds = array<i64: 1, 128>}, {transform_indices = @transform_9, window_bounds = array<i64: 8, 128>}]} {
    %c0_i32 = arith.constant 0 : i32
    %0 = arith.cmpi eq, %arg1, %c0_i32 : i32
    %1 = arith.extui %0 : i1 to i32
    %c0_i32_0 = arith.constant 0 : i32
    %2 = arith.cmpi ne, %1, %c0_i32_0 : i32
    scf.if %2 {
      %cst_15 = arith.constant 0.000000e+00 : f32
      %20 = vector.broadcast %cst_15 : f32 to vector<8x128xf32>
      %c0_16 = arith.constant 0 : index
      %c0_17 = arith.constant 0 : index
      %21 = vector.load %arg12[%c0_16, %c0_17] : memref<8x128xf32, #tpu.memory_space<vmem>>, vector<8x128xf32>
      tpu.vector_store %arg12[%c0_16, %c0_17], %20 {strides = array<i32>} : memref<8x128xf32, #tpu.memory_space<vmem>>, vector<8x128xf32>,
    } else {
    }
    %c0 = arith.constant 0 : index
    %c0_1 = arith.constant 0 : index
    %c0_2 = arith.constant 0 : index
    %3 = vector.load %arg2[%c0, %c0_1, %c0_2] : memref<8x256x128xbf16, #tpu.memory_space<vmem>>, vector<8x256x128xbf16>
    %4 = vector.shape_cast %3 : vector<8x256x128xbf16> to vector<2048x128xbf16>
    %c0_3 = arith.constant 0 : index
    %c0_4 = arith.constant 0 : index
    %5 = vector.load %arg3[%c0_3, %c0_4] : memref<128x128xbf16, #tpu.memory_space<vmem>>, vector<128x128xbf16>
    %cst = arith.constant dense<0.000000e+00> : vector<2048x128xf32>
    %6 = tpu.matmul %4, %5, %cst {dimension_numbers = #tpu.dot_dimension_numbers<[1], [0], [0], [1], [0, 0, 1, 1], [], []>} : vector<2048x128xbf16>, vector<128x128xbf16>, vector<2048x128xf32> -> vector<2048x128xf32>
    %c0_5 = arith.constant 0 : index
    %c0_6 = arith.constant 0 : index
    %7 = vector.load %arg4[%c0_5, %c0_6] : memref<1x128xf32, #tpu.memory_space<vmem>>, vector<1x128xf32>
    %8 = vector.broadcast %7 : vector<1x128xf32> to vector<2048x128xf32>
    %9 = arith.addf %6, %8 : vector<2048x128xf32>
    %cst_7 = arith.constant 0.000000e+00 : f32
    %10 = vector.broadcast %cst_7 : f32 to vector<2048x128xf32>
    %11 = arith.maximumf %9, %10 : vector<2048x128xf32>
    %c0_8 = arith.constant 0 : index
    %c0_9 = arith.constant 0 : index
    %12 = vector.load %arg12[%c0_8, %c0_9] : memref<8x128xf32, #tpu.memory_space<vmem>>, vector<8x128xf32>
    %13 = vector.shape_cast %11 : vector<2048x128xf32> to vector<8x256x128xf32>
    %cst_10 = arith.constant dense<0.000000e+00> : vector<8x128xf32>
    %14 = vector.multi_reduction <add>, %13, %cst_10 [1] : vector<8x256x128xf32> to vector<8x128xf32>
    %15 = arith.addf %12, %14 : vector<8x128xf32>
    %c0_11 = arith.constant 0 : index
    %c0_12 = arith.constant 0 : index
    %16 = vector.load %arg12[%c0_11, %c0_12] : memref<8x128xf32, #tpu.memory_space<vmem>>, vector<8x128xf32>
    tpu.vector_store %arg12[%c0_11, %c0_12], %15 {strides = array<i32>} : memref<8x128xf32, #tpu.memory_space<vmem>>, vector<8x128xf32>,
    %c0_i32_13 = arith.constant 0 : i32
    %17 = arith.cmpi eq, %arg1, %c0_i32_13 : i32
    %18 = arith.extui %17 : i1 to i32
    %c0_i32_14 = arith.constant 0 : i32
    %19 = arith.cmpi ne, %18, %c0_i32_14 : i32
    scf.if %19 {
      %c0_15 = arith.constant 0 : index
      %c0_16 = arith.constant 0 : index
      %20 = vector.load %arg12[%c0_15, %c0_16] : memref<8x128xf32, #tpu.memory_space<vmem>>, vector<8x128xf32>
      %cst_17 = arith.constant 3.906250e-03 : f32
      %21 = vector.broadcast %cst_17 : f32 to vector<8x128xf32>
      %22 = arith.mulf %20, %21 : vector<8x128xf32>
      %23 = arith.truncf %22 : vector<8x128xf32> to vector<8x128xbf16>
      %c0_18 = arith.constant 0 : index
      %c0_19 = arith.constant 0 : index
      %24 = vector.load %arg5[%c0_18, %c0_19] : memref<128x512xbf16, #tpu.memory_space<vmem>>, vector<128x512xbf16>
      %cst_20 = arith.constant dense<0.000000e+00> : vector<8x512xf32>
      %25 = tpu.matmul %23, %24, %cst_20 {dimension_numbers = #tpu.dot_dimension_numbers<[1], [0], [0], [1], [0, 0, 1, 1], [], []>} : vector<8x128xbf16>, vector<128x512xbf16>, vector<8x512xf32> -> vector<8x512xf32>
      %c0_21 = arith.constant 0 : index
      %c0_22 = arith.constant 0 : index
      %26 = vector.load %arg6[%c0_21, %c0_22] : memref<1x512xf32, #tpu.memory_space<vmem>>, vector<1x512xf32>
      %27 = vector.broadcast %26 : vector<1x512xf32> to vector<8x512xf32>
      %28 = arith.addf %25, %27 : vector<8x512xf32>
      %cst_23 = arith.constant 0.000000e+00 : f32
      %29 = vector.broadcast %cst_23 : f32 to vector<8x512xf32>
      %30 = arith.maximumf %28, %29 : vector<8x512xf32>
      %31 = arith.truncf %30 : vector<8x512xf32> to vector<8x512xbf16>
      %c0_24 = arith.constant 0 : index
      %c0_25 = arith.constant 0 : index
      %32 = vector.load %arg7[%c0_24, %c0_25] : memref<512x256xbf16, #tpu.memory_space<vmem>>, vector<512x256xbf16>
      %cst_26 = arith.constant dense<0.000000e+00> : vector<8x256xf32>
      %33 = tpu.matmul %31, %32, %cst_26 {dimension_numbers = #tpu.dot_dimension_numbers<[1], [0], [0], [1], [0, 0, 1, 1], [], []>} : vector<8x512xbf16>, vector<512x256xbf16>, vector<8x256xf32> -> vector<8x256xf32>
      %c0_27 = arith.constant 0 : index
      %c0_28 = arith.constant 0 : index
      %34 = vector.load %arg8[%c0_27, %c0_28] : memref<1x256xf32, #tpu.memory_space<vmem>>, vector<1x256xf32>
      %35 = vector.broadcast %34 : vector<1x256xf32> to vector<8x256xf32>
      %36 = arith.addf %33, %35 : vector<8x256xf32>
      %cst_29 = arith.constant 0.000000e+00 : f32
      %37 = vector.broadcast %cst_29 : f32 to vector<8x256xf32>
      %38 = arith.maximumf %36, %37 : vector<8x256xf32>
      %39 = arith.truncf %38 : vector<8x256xf32> to vector<8x256xbf16>
      %c0_30 = arith.constant 0 : index
      %c0_31 = arith.constant 0 : index
      %40 = vector.load %arg9[%c0_30, %c0_31] : memref<256x128xbf16, #tpu.memory_space<vmem>>, vector<256x128xbf16>
      %cst_32 = arith.constant dense<0.000000e+00> : vector<8x128xf32>
      %41 = tpu.matmul %39, %40, %cst_32 {dimension_numbers = #tpu.dot_dimension_numbers<[1], [0], [0], [1], [0, 0, 1, 1], [], []>} : vector<8x256xbf16>, vector<256x128xbf16>, vector<8x128xf32> -> vector<8x128xf32>
      %c0_33 = arith.constant 0 : index
      %c0_34 = arith.constant 0 : index
      %42 = vector.load %arg10[%c0_33, %c0_34] : memref<1x128xf32, #tpu.memory_space<vmem>>, vector<1x128xf32>
      %43 = vector.broadcast %42 : vector<1x128xf32> to vector<8x128xf32>
      %44 = arith.addf %41, %43 : vector<8x128xf32>
      %c0_35 = arith.constant 0 : index
      %c0_36 = arith.constant 0 : index
      %45 = vector.load %arg11[%c0_35, %c0_36] : memref<8x128xf32, #tpu.memory_space<vmem>>, vector<8x128xf32>
      tpu.vector_store %arg11[%c0_35, %c0_36], %44 {strides = array<i32>} : memref<8x128xf32, #tpu.memory_space<vmem>>, vector<8x128xf32>,
    } else {
    }
    return
  }
  func.func @transform_0(%arg0: i32, %arg1: i32) -> (i32, i32, i32) {
    %c0_i32 = arith.constant 0 : i32
    %c0_i32_0 = arith.constant 0 : i32
    return %arg0, %arg1, %c0_i32 : i32, i32, i32
  }
  func.func @transform_1(%arg0: i32, %arg1: i32) -> (i32, i32) {
    %c0_i32 = arith.constant 0 : i32
    %c0_i32_0 = arith.constant 0 : i32
    %c0_i32_1 = arith.constant 0 : i32
    return %c0_i32, %c0_i32_0 : i32, i32
  }
  func.func @transform_2(%arg0: i32, %arg1: i32) -> (i32, i32) {
    %c0_i32 = arith.constant 0 : i32
    %c0_i32_0 = arith.constant 0 : i32
    %c0_i32_1 = arith.constant 0 : i32
    return %c0_i32, %c0_i32_0 : i32, i32
  }
  func.func @transform_3(%arg0: i32, %arg1: i32) -> (i32, i32) {
    %c0_i32 = arith.constant 0 : i32
    %c0_i32_0 = arith.constant 0 : i32
    %c0_i32_1 = arith.constant 0 : i32
    return %c0_i32, %c0_i32_0 : i32, i32
  }
  func.func @transform_4(%arg0: i32, %arg1: i32) -> (i32, i32) {
    %c0_i32 = arith.constant 0 : i32
    %c0_i32_0 = arith.constant 0 : i32
    %c0_i32_1 = arith.constant 0 : i32
    return %c0_i32, %c0_i32_0 : i32, i32
  }
  func.func @transform_5(%arg0: i32, %arg1: i32) -> (i32, i32) {
    %c0_i32 = arith.constant 0 : i32
    %c0_i32_0 = arith.constant 0 : i32
    %c0_i32_1 = arith.constant 0 : i32
    return %c0_i32, %c0_i32_0 : i32, i32
  }
  func.func @transform_6(%arg0: i32, %arg1: i32) -> (i32, i32) {
    %c0_i32 = arith.constant 0 : i32
    %c0_i32_0 = arith.constant 0 : i32
    %c0_i32_1 = arith.constant 0 : i32
    return %c0_i32, %c0_i32_0 : i32, i32
  }
  func.func @transform_7(%arg0: i32, %arg1: i32) -> (i32, i32) {
    %c0_i32 = arith.constant 0 : i32
    %c0_i32_0 = arith.constant 0 : i32
    %c0_i32_1 = arith.constant 0 : i32
    return %c0_i32, %c0_i32_0 : i32, i32
  }
  func.func @transform_8(%arg0: i32, %arg1: i32) -> (i32, i32) {
    %c0_i32 = arith.constant 0 : i32
    %c0_i32_0 = arith.constant 0 : i32
    %c0_i32_1 = arith.constant 0 : i32
    return %c0_i32, %c0_i32_0 : i32, i32
  }
  func.func @transform_9(%arg0: i32, %arg1: i32) -> (i32, i32) {
    %c0_i32 = arith.constant 0 : i32
    %c0_i32_0 = arith.constant 0 : i32
    return %arg0, %c0_i32 : i32, i32
  }
}

</mosaic_0001>

<bundles_post_ra>
// kernel: tpu_custom_call.1
= control target key start
LH: loop header
LB: loop body
LE: loop exit
PB: predicated region body
PF: predicated region fallthrough
CT: control target
= control target key end

     0   :  { %14 = vsyncpa [#allocation4], 0  ;;  %s5495_s0 = inlined_call_operand.hbm [shape: bf16[8,256,128], index: 0, kind: input, shape index: {}]   ;;  %s5496_s1 = inlined_call_operand.hbm [shape: bf16[128,128], index: 1, kind: input, shape index: {}]   ;;  %s5497_s2 = inlined_call_operand.vmem [shape: f32[1,128], index: 2, kind: input, shape index: {}]   ;;  %s5498_s3 = inlined_call_operand.hbm [shape: bf16[128,512], index: 3, kind: input, shape index: {}]   ;;  %s5499_s4 = inlined_call_operand.vmem [shape: f32[1,512], index: 4, kind: input, shape index: {}]   ;;  %s5500_s5 = inlined_call_operand.hbm [shape: bf16[512,256], index: 5, kind: input, shape index: {}]   ;;  %s5501_s6 = inlined_call_operand.vmem [shape: f32[1,256], index: 6, kind: input, shape index: {}]   ;;  %s5502_s7 = inlined_call_operand.hbm [shape: bf16[256,128], index: 7, kind: input, shape index: {}]   ;;  %s5503_s8 = inlined_call_operand.vmem [shape: f32[1,128], index: 8, kind: input, shape index: {}]   ;;  %s5504_s9 = inlined_call_operand.hbm [shape: f32[8,128], index: 9, kind: output, shape index: {}]  }
   0x1   :  { %15 = vsyncpa [#allocation7], 0 }
   0x2   :  { %16 = vsyncpa [#allocation10], 0 }
   0x3   :  { %17 = vsyncpa [#allocation5], 0  ;;  %s4975_s30 = smov [#allocation6]   ;;  %s4976_s11 = smov [#allocation9]  }
   0x4   :  { %s35_s10 = sshll.u32 %s4975_s30, 4  ;;  %s63_s12 = sshll.u32 %s4976_s11, 4  ;;  %s36_s10 = int_to_ptr.vmem [resolvable:$true] %s35_s10  ;;  %s5038_s12 = int_to_ptr.vmem [resolvable:$true] %s63_s12 }
   0x5   :  { %s4835_s15 = scalar_lea.hbm %s5496_s1, 1024 }
   0x6   :  { %p4836_p0 = scmp.ne.s32.totalorder %s5496_s1, %s4835_s15  ;;  %p4839_p1 = scmp.lt.u32.totalorder %s4835_s15, %s5496_s1 }
   0x8   :  { %p4841_p2 = pnand %p4839_p1, %p4836_p0 }
   0xa   :  { %4844 = shalt.err (!%p4841_p2)
}
   0xb   :  { %s4845_s20 = scalar_lea.vmem %s36_s10, 1024  ;;  %p4850_p4 = scmp.lt.s32.totalorder %s36_s10, %s36_s10 }
   0xc   :  { %p4846_p3 = scmp.ne.s32.totalorder %s36_s10, %s4845_s20  ;;  %p4851_p5 = scmp.lt.s32.totalorder %s4845_s20, %s4845_s20 }
   0xe   :  { %p4852_p6 = por %p4851_p5, %p4850_p4 }
  0x10   :  { %p4853_p7 = pnand %p4852_p6, %p4846_p3 }
  0x12   :  { %4856 = shalt.err (!%p4853_p7)
}
  0x13   :  { %s4977_s21 = smov 64   ;;  %s4978_s22 = smov 4  }
  0x14   :  { %41 = dma.hbm_to_vmem [thread:$0]  %s5496_s1, 1024, %s36_s10, [#allocation7], %s4977_s21, %s4977_s21, %s4978_s22  }
  0x15   :  { %s4857_s27 = scalar_lea.hbm %s5500_s5, 8192 }
  0x16   :  { %p4858_p8 = scmp.ne.s32.totalorder %s5500_s5, %s4857_s27  ;;  %p4861_p9 = scmp.lt.u32.totalorder %s4857_s27, %s5500_s5 }
  0x18   :  { %p4863_p10 = pnand %p4861_p9, %p4858_p8 }
  0x1a   :  { %4866 = shalt.err (!%p4863_p10)
}
  0x1b   :  { %s4867_s13 = scalar_lea.vmem %s5038_s12, 8192  ;;  %p4872_p12 = scmp.lt.s32.totalorder %s5038_s12, %s5038_s12 }
  0x1c   :  { %p4868_p11 = scmp.ne.s32.totalorder %s5038_s12, %s4867_s13  ;;  %p4873_p13 = scmp.lt.s32.totalorder %s4867_s13, %s4867_s13 }
  0x1e   :  { %p4874_p0 = por %p4873_p13, %p4872_p12 }
  0x20   :  { %p4875_p1 = pnand %p4874_p0, %p4868_p11 }
  0x22   :  { %4878 = shalt.err (!%p4875_p1)
}
  0x23   :  { %s4979_s1 = smov 128   ;;  %s4980_s10 = smov 8  }
  0x24   :  { %69 = dma.hbm_to_vmem [thread:$0]  %s5500_s5, 8192, %s5038_s12, [#allocation10], %s4979_s1, %s4979_s1, %s4980_s10  }
  0x25   :  { %s4981_s16 = smov [#allocation3]   ;;  %s4982_s18 = smov [#allocation8]  }
  0x26   :  { %s23_s17 = sshll.u32 %s4981_s16, 4  ;;  %s49_s19 = sshll.u32 %s4982_s18, 4  ;;  %s24_s17 = int_to_ptr.vmem [resolvable:$true] %s23_s17  ;;  %s5072_s19 = int_to_ptr.vmem [resolvable:$true] %s49_s19 }
  0x27   :  { %s4879_s24 = scalar_lea.hbm %s5495_s0, 16384 }
  0x28   :  { %p4880_p2 = scmp.ne.s32.totalorder %s5495_s0, %s4879_s24  ;;  %p4883_p3 = scmp.lt.u32.totalorder %s4879_s24, %s5495_s0 }
  0x2a   :  { %p4885_p4 = pnand %p4883_p3, %p4880_p2 }
  0x2c   :  { %4888 = shalt.err (!%p4885_p4)
}
  0x2d   :  { %s4889_s5 = scalar_lea.vmem %s24_s17, 16384  ;;  %p4894_p6 = scmp.lt.s32.totalorder %s24_s17, %s24_s17 }
  0x2e   :  { %p4890_p5 = scmp.ne.s32.totalorder %s24_s17, %s4889_s5  ;;  %p4895_p7 = scmp.lt.s32.totalorder %s4889_s5, %s4889_s5 }
  0x30   :  { %p4896_p8 = por %p4895_p7, %p4894_p6 }
  0x32   :  { %p4897_p9 = pnand %p4896_p8, %p4890_p5 }
  0x34   :  { %4900 = shalt.err (!%p4897_p9)
}
  0x35   :  { %29 = dma.hbm_to_vmem [thread:$0]  %s5495_s0, 16384, %s24_s17, [#allocation4], %s4977_s21, %s4977_s21, %s4978_s22  }
  0x36   :  { %s4901_s13 = scalar_lea.hbm %s5498_s3, 4096 }
  0x37   :  { %p4902_p10 = scmp.ne.s32.totalorder %s5498_s3, %s4901_s13  ;;  %p4905_p11 = scmp.lt.u32.totalorder %s4901_s13, %s5498_s3 }
  0x39   :  { %p4907_p12 = pnand %p4905_p11, %p4902_p10 }
  0x3b   :  { %4910 = shalt.err (!%p4907_p12)
}
  0x3c   :  { %s4911_s16 = scalar_lea.vmem %s5072_s19, 4096  ;;  %p4916_p0 = scmp.lt.s32.totalorder %s5072_s19, %s5072_s19 }
  0x3d   :  { %p4912_p13 = scmp.ne.s32.totalorder %s5072_s19, %s4911_s16  ;;  %p4917_p1 = scmp.lt.s32.totalorder %s4911_s16, %s4911_s16 }
  0x3f   :  { %p4918_p2 = por %p4917_p1, %p4916_p0 }
  0x41   :  { %p4919_p3 = pnand %p4918_p2, %p4912_p13 }
  0x43   :  { %4922 = shalt.err (!%p4919_p3)
}
  0x44   :  { %s4983_s0 = smov 256   ;;  %s4984_s17 = smov 16  }
  0x45   :  { %55 = dma.hbm_to_vmem [thread:$0]  %s5498_s3, 4096, %s5072_s19, [#allocation7], %s4983_s0, %s4983_s0, %s4984_s17  }
  0x46   :  { %s4985_s23 = smov [#allocation11]   ;;  %s4923_s27 = scalar_lea.hbm %s5502_s7, 2048 }
  0x47   :  { %s77_s24 = sshll.u32 %s4985_s23, 4  ;;  %p4924_p4 = scmp.ne.s32.totalorder %s5502_s7, %s4923_s27  ;;  %s78_s24 = int_to_ptr.vmem [resolvable:$true] %s77_s24 }
  0x48   :  { %p4927_p5 = scmp.lt.u32.totalorder %s4923_s27, %s5502_s7 }
  0x4a   :  { %p4929_p6 = pnand %p4927_p5, %p4924_p4 }
  0x4c   :  { %4932 = shalt.err (!%p4929_p6)
}
  0x4d   :  { %s4933_s30 = scalar_lea.vmem %s78_s24, 2048  ;;  %p4938_p8 = scmp.lt.s32.totalorder %s78_s24, %s78_s24 }
  0x4e   :  { %p4934_p7 = scmp.ne.s32.totalorder %s78_s24, %s4933_s30  ;;  %p4939_p9 = scmp.lt.s32.totalorder %s4933_s30, %s4933_s30 }
  0x50   :  { %p4940_p10 = por %p4939_p9, %p4938_p8 }
  0x52   :  { %p4941_p11 = pnand %p4940_p10, %p4934_p7 }
  0x54   :  { %4944 = shalt.err (!%p4941_p11)
}
  0x55   :  { %83 = dma.hbm_to_vmem [thread:$0]  %s5502_s7, 2048, %s78_s24, [#allocation10], %s4977_s21, %s4977_s21, %s4978_s22  }
  0x56   :  { %4967 = dma.done.wait [#allocation4], 16384  }
  0x57   :  { %4968 = vsyncadd [#allocation4], 4294950912 }
  0x58   :  { %4969 = dma.done.wait [#allocation7], 5120  }
  0x59   :  { %4970 = vsyncadd [#allocation7], 4294962176 }
  0x5a   :  { %4971 = dma.done.wait [#allocation10], 10240  }
  0x5b   :  { %4972 = vsyncadd [#allocation10], 4294957056  ;;  %v4537_v0 = vld [vmem:[#allocation6] sm:$0xff]   ;;  %v4538_v1 = vld [vmem:[#allocation6 + $0x8] sm:$0xff]   ;;  %vm2820_vm0 = vcmask 1041409   ;;  %vm2822_vm1 = vcmask 1042434  }
  0x5c   :  { %4230 = vmatprep.subr.bf16.mxu0 %v4537_v0  ;;  %4502 = vmatprep.subr.bf16.mxu1 %v4537_v0  ;;  %v4539_v2 = vld [vmem:[#allocation6 + $0x10] sm:$0xff]   ;;  %v4540_v3 = vld [vmem:[#allocation6 + $0x18] sm:$0xff]   ;;  %v4545_v4 = vld [vmem:[#allocation3] sm:$0xff]   ;;  %vm2824_vm2 = vcmask 1043459   ;;  %vm2826_vm3 = vcmask 1044484   ;;  %vm2828_vm4 = vcmask 1045509  }
  0x5d   :  { %4231 = vmatpush3.bf16.msra.mxu0 %v4537_v0  ;;  %4510 = vmatpush3.bf16.msra.mxu1 %v4537_v0  ;;  %v4541_v5 = vld [vmem:[#allocation6 + $0x20] sm:$0xff]   ;;  %v4542_v6 = vld [vmem:[#allocation6 + $0x28] sm:$0xff]   ;;  %v4543_v7 = vld [vmem:[#allocation6 + $0x30] sm:$0xff]   ;;  %vm2830_vm5 = vcmask 1046534   ;;  %vm2832_vm6 = vcmask 1047559   ;;  %s4987_s16 = smov [#allocation12]  }
  0x5e   :  { %4232 = vmatprep.subr.bf16.mxu0 %v4538_v1  ;;  %4503 = vmatprep.subr.bf16.mxu1 %v4538_v1  ;;  %v4544_v8 = vld [vmem:[#allocation6 + $0x38] sm:$0xff]   ;;  %v4546_v9 = vld [vmem:[#allocation3 + $0x8] sm:$0xff]   ;;  %v4547_v10 = vld [vmem:[#allocation3 + $0x10] sm:$0xff]   ;;  %s3811_s0 = sshll.u32 %s4987_s16, 4  ;;  %s3812_s0 = int_to_ptr.vmem [resolvable:$true] %s3811_s0 }
  0x5f   :  { %4246 = vmatprep.mubr.bf16.mxu0 %v4545_v4  ;;  %v4548_v11 = vld [vmem:[#allocation3 + $0x18] sm:$0xff]   ;;  %v4549_v12 = vld [vmem:[#allocation3 + $0x20] sm:$0xff]   ;;  %v4550_v13 = vld [vmem:[#allocation3 + $0x28] sm:$0xff]   ;;  %s4945_s17 = scalar_lea.vmem %s3812_s0, 128  ;;  %p4950_p13 = scmp.lt.s32.totalorder %s3812_s0, %s3812_s0 }
  0x60   :  { %v4551_v14 = vld [vmem:[#allocation3 + $0x30] sm:$0xff]   ;;  %v4552_v15 = vld [vmem:[#allocation3 + $0x38] sm:$0xff]   ;;  %v4553_v16 = vld [vmem:[#allocation3 + $0x40] sm:$0xff]   ;;  %p4946_p12 = scmp.ne.s32.totalorder %s3812_s0, %s4945_s17  ;;  %p4951_p0 = scmp.lt.s32.totalorder %s4945_s17, %s4945_s17 }
  0x61   :  { %4233 = vmatpush3.bf16.msra.mxu0 %v4538_v1  ;;  %4511 = vmatpush3.bf16.msra.mxu1 %v4538_v1  ;;  %v4554_v17 = vld [vmem:[#allocation3 + $0x48] sm:$0xff]   ;;  %v4555_v18 = vld [vmem:[#allocation3 + $0x50] sm:$0xff]   ;;  %v4556_v19 = vld [vmem:[#allocation3 + $0x58] sm:$0xff]  }
  0x62   :  { %4234 = vmatprep.subr.bf16.mxu0 %v4539_v2  ;;  %4504 = vmatprep.subr.bf16.mxu1 %v4539_v2  ;;  %v4557_v20 = vld [vmem:[#allocation3 + $0x60] sm:$0xff]   ;;  %v4558_v21 = vld [vmem:[#allocation3 + $0x68] sm:$0xff]   ;;  %v4559_v22 = vld [vmem:[#allocation3 + $0x70] sm:$0xff]   ;;  %p4952_p1 = por %p4951_p0, %p4950_p13 }
  0x63   :  { %v4560_v23 = vld [vmem:[#allocation3 + $0x78] sm:$0xff]   ;;  %v4561_v24 = vld [vmem:[#allocation3 + $0x80] sm:$0xff]   ;;  %v4562_v25 = vld [vmem:[#allocation3 + $0x88] sm:$0xff]  }
  0x64   :  { %v4563_v26 = vld [vmem:[#allocation3 + $0x90] sm:$0xff]   ;;  %v4564_v27 = vld [vmem:[#allocation3 + $0x98] sm:$0xff]   ;;  %v4565_v28 = vld [vmem:[#allocation3 + $0xa0] sm:$0xff]   ;;  %p4953_p2 = pnand %p4952_p1, %p4946_p12 }
  0x65   :  { %4235 = vmatpush3.bf16.msra.mxu0 %v4539_v2  ;;  %4512 = vmatpush3.bf16.msra.mxu1 %v4539_v2  ;;  %v4566_v29 = vld [vmem:[#allocation3 + $0xa8] sm:$0xff]   ;;  %v4567_v30 = vld [vmem:[#allocation3 + $0xb0] sm:$0xff]   ;;  %v4568_v31 = vld [vmem:[#allocation3 + $0xb8] sm:$0xff]  }
  0x66   :  { %4236 = vmatprep.subr.bf16.mxu0 %v4540_v3  ;;  %4505 = vmatprep.subr.bf16.mxu1 %v4540_v3  ;;  %v4569_v32 = vld [vmem:[#allocation3 + $0xc0] sm:$0xff]   ;;  %v4570_v33 = vld [vmem:[#allocation3 + $0xc8] sm:$0xff]   ;;  %v4601_v34 = vld [vmem:[#allocation3 + $0x2d0] sm:$0xff]  }
  0x67   :  { %v4602_v35 = vld [vmem:[#allocation3 + $0x2d8] sm:$0xff]   ;;  %4426 = vmatprep.mubr.bf16.mxu1 %v4601_v34  ;;  %v4571_v36 = vld [vmem:[#allocation3 + $0xd0] sm:$0xff]   ;;  %v4605_v38 = vld [vmem:[#allocation3 + $0x2e0] sm:$0xff]  }
  0x68   :  { %v4572_v37 = vld [vmem:[#allocation3 + $0xd8] sm:$0xff]   ;;  %v4606_v39 = vld [vmem:[#allocation3 + $0x2e8] sm:$0xff]   ;;  %v4573_v40 = vld [vmem:[#allocation3 + $0xe0] sm:$0xff]  }
  0x69   :  { %4237 = vmatpush3.bf16.msra.mxu0 %v4540_v3  ;;  %4513 = vmatpush3.bf16.msra.mxu1 %v4540_v3  ;;  %v4574_v41 = vld [vmem:[#allocation3 + $0xe8] sm:$0xff]   ;;  %v4609_v42 = vld [vmem:[#allocation3 + $0x2f0] sm:$0xff]   ;;  %v4610_v43 = vld [vmem:[#allocation3 + $0x2f8] sm:$0xff]  }
  0x6a   :  { %4238 = vmatprep.subr.bf16.mxu0 %v4541_v5  ;;  %4506 = vmatprep.subr.bf16.mxu1 %v4541_v5  ;;  %v4575_v44 = vld [vmem:[#allocation3 + $0xf0] sm:$0xff]   ;;  %v4576_v45 = vld [vmem:[#allocation3 + $0xf8] sm:$0xff]   ;;  %v4613_v46 = vld [vmem:[#allocation3 + $0x300] sm:$0xff]  }
  0x6b   :  { %v4614_v47 = vld [vmem:[#allocation3 + $0x308] sm:$0xff]   ;;  %v4577_v48 = vld [vmem:[#allocation3 + $0x100] sm:$0xff]   ;;  %v4617_v50 = vld [vmem:[#allocation3 + $0x310] sm:$0xff]  }
  0x6c   :  { %v4578_v49 = vld [vmem:[#allocation3 + $0x108] sm:$0xff]   ;;  %v4618_v51 = vld [vmem:[#allocation3 + $0x318] sm:$0xff]   ;;  %v4579_v52 = vld [vmem:[#allocation3 + $0x110] sm:$0xff]  }
  0x6d   :  { %4239 = vmatpush3.bf16.msra.mxu0 %v4541_v5  ;;  %4514 = vmatpush3.bf16.msra.mxu1 %v4541_v5  ;;  %v4621_v53 = vld [vmem:[#allocation3 + $0x320] sm:$0xff]   ;;  %v4622_v54 = vld [vmem:[#allocation3 + $0x328] sm:$0xff]   ;;  %v4580_v55 = vld [vmem:[#allocation3 + $0x118] sm:$0xff]  }
  0x6e   :  { %4240 = vmatprep.subr.bf16.mxu0 %v4542_v6  ;;  %4507 = vmatprep.subr.bf16.mxu1 %v4542_v6  ;;  %v4581_v56 = vld [vmem:[#allocation3 + $0x120] sm:$0xff]   ;;  %v4625_v57 = vld [vmem:[#allocation3 + $0x330] sm:$0xff]   ;;  %v4626_v58 = vld [vmem:[#allocation3 + $0x338] sm:$0xff]  }
  0x6f   :  { %v4582_v59 = vld [vmem:[#allocation3 + $0x128] sm:$0xff]   ;;  %v4583_v60 = vld [vmem:[#allocation3 + $0x130] sm:$0xff]   ;;  %v4629_v61 = vld [vmem:[#allocation3 + $0x340] sm:$0xff]  }
  0x70   :  { %v4630_v62 = vld [vmem:[#allocation3 + $0x348] sm:$0xff]   ;;  %v4584_v63 = vld [vmem:[#allocation3 + $0x138] sm:$0xff]   ;;  %v4585_v0 = vld [vmem:[#allocation3 + $0x140] sm:$0xff]  }
  0x71   :  { %4241 = vmatpush3.bf16.msra.mxu0 %v4542_v6  ;;  %4515 = vmatpush3.bf16.msra.mxu1 %v4542_v6  ;;  %v4633_v1 = vld [vmem:[#allocation3 + $0x350] sm:$0xff]   ;;  %v4634_v2 = vld [vmem:[#allocation3 + $0x358] sm:$0xff]   ;;  %v4586_v3 = vld [vmem:[#allocation3 + $0x148] sm:$0xff]  }
  0x72   :  { %4242 = vmatprep.subr.bf16.mxu0 %v4543_v7  ;;  %4508 = vmatprep.subr.bf16.mxu1 %v4543_v7  ;;  %v4587_v4 = vld [vmem:[#allocation3 + $0x150] sm:$0xff]   ;;  %v4637_v5 = vld [vmem:[#allocation3 + $0x360] sm:$0xff]   ;;  %v4638_v6 = vld [vmem:[#allocation3 + $0x368] sm:$0xff]  }
  0x73   :  { %v4600_v34 = vld [vmem:[#allocation3 + $0x1b8] sm:$0xff]  }
  0x75   :  { %4243 = vmatpush3.bf16.msra.mxu0 %v4543_v7  ;;  %4516 = vmatpush3.bf16.msra.mxu1 %v4543_v7  ;;  %v4588_v7 = vld [vmem:[#allocation3 + $0x158] sm:$0xff]  }
  0x76   :  { %4244 = vmatprep.subr.bf16.mxu0 %v4544_v8  ;;  %4509 = vmatprep.subr.bf16.mxu1 %v4544_v8 }
  0x79   :  { %4245 = vmatpush3.bf16.msra.mxu0 %v4544_v8  ;;  %4517 = vmatpush3.bf16.msra.mxu1 %v4544_v8  ;;  %v4589_v8 = vld [vmem:[#allocation3 + $0x160] sm:$0xff]  }
  0x7c   :  { %4247 = vmatmul.mubr.bf16.vlgmr.msra.gmra.mrb[0].mxu0 %v4546_v9  ;;  %4427 = vmatmul.mubr.bf16.vlgmr.msra.gmra.mrb[0].mxu1 %v4602_v35  ;;  %v4641_v9 = vld [vmem:[#allocation3 + $0x370] sm:$0xff]  }
  0x7d   :  { %4250 = vmatprep.mubr.bf16.mxu0 %v4547_v10  ;;  %4430 = vmatprep.mubr.bf16.mxu1 %v4605_v38  ;;  %v4642_v10 = vld [vmem:[#allocation3 + $0x378] sm:$0xff]  }
  0x84   :  { %4251 = vmatmul.mubr.bf16.gmra.mrb[4].mxu0 %v4548_v11  ;;  %4431 = vmatmul.mubr.bf16.gmra.mrb[4].mxu1 %v4606_v39  ;;  %v4590_v11 = vld [vmem:[#allocation3 + $0x168] sm:$0xff]  }
  0x85   :  { %4254 = vmatprep.mubr.bf16.mxu0 %v4549_v12  ;;  %4434 = vmatprep.mubr.bf16.mxu1 %v4609_v42  ;;  %v4591_v12 = vld [vmem:[#allocation3 + $0x170] sm:$0xff]  }
  0x8c   :  { %4255 = vmatmul.mubr.bf16.gmra.mrb[8].mxu0 %v4550_v13  ;;  %4435 = vmatmul.mubr.bf16.gmra.mrb[8].mxu1 %v4610_v43  ;;  %v4645_v13 = vld [vmem:[#allocation3 + $0x380] sm:$0xff]  }
  0x8d   :  { %4258 = vmatprep.mubr.bf16.mxu0 %v4551_v14  ;;  %4438 = vmatprep.mubr.bf16.mxu1 %v4613_v46  ;;  %v4646_v14 = vld [vmem:[#allocation3 + $0x388] sm:$0xff]  }
  0x94   :  { %4259 = vmatmul.mubr.bf16.gmra.mrb[12].mxu0 %v4552_v15  ;;  %4439 = vmatmul.mubr.bf16.gmra.mrb[12].mxu1 %v4614_v47  ;;  %v4592_v15 = vld [vmem:[#allocation3 + $0x178] sm:$0xff]  }
  0x95   :  { %4262 = vmatprep.mubr.bf16.mxu0 %v4553_v16  ;;  %4442 = vmatprep.mubr.bf16.mxu1 %v4617_v50  ;;  %v4593_v16 = vld [vmem:[#allocation3 + $0x180] sm:$0xff]   ;;  %v4604_v50 = vld [vmem:[#allocation3 + $0x1c8] sm:$0xff]  }
  0x9c   :  { %4263 = vmatmul.mubr.bf16.gmra.mrb[16].mxu0 %v4554_v17  ;;  %4443 = vmatmul.mubr.bf16.gmra.mrb[16].mxu1 %v4618_v51  ;;  %v4649_v17 = vld [vmem:[#allocation3 + $0x390] sm:$0xff]  }
  0x9d   :  { %4266 = vmatprep.mubr.bf16.mxu0 %v4555_v18  ;;  %4446 = vmatprep.mubr.bf16.mxu1 %v4621_v53  ;;  %v4650_v18 = vld [vmem:[#allocation3 + $0x398] sm:$0xff]  }
  0xa4   :  { %4267 = vmatmul.mubr.bf16.gmra.mrb[20].mxu0 %v4556_v19  ;;  %4447 = vmatmul.mubr.bf16.gmra.mrb[20].mxu1 %v4622_v54  ;;  %v4594_v19 = vld [vmem:[#allocation3 + $0x188] sm:$0xff]  }
  0xa5   :  { %4270 = vmatprep.mubr.bf16.mxu0 %v4557_v20  ;;  %4450 = vmatprep.mubr.bf16.mxu1 %v4625_v57  ;;  %v4595_v20 = vld [vmem:[#allocation3 + $0x190] sm:$0xff]  }
  0xac   :  { %4271 = vmatmul.mubr.bf16.gmra.mrb[24].mxu0 %v4558_v21  ;;  %4451 = vmatmul.mubr.bf16.gmra.mrb[24].mxu1 %v4626_v58  ;;  %v4653_v21 = vld [vmem:[#allocation3 + $0x3a0] sm:$0xff]  }
  0xad   :  { %4274 = vmatprep.mubr.bf16.mxu0 %v4559_v22  ;;  %4454 = vmatprep.mubr.bf16.mxu1 %v4629_v61  ;;  %v4654_v22 = vld [vmem:[#allocation3 + $0x3a8] sm:$0xff]  }
  0xb4   :  { %4275 = vmatmul.mubr.bf16.gmra.mrb[28].mxu0 %v4560_v23  ;;  %4455 = vmatmul.mubr.bf16.gmra.mrb[28].mxu1 %v4630_v62  ;;  %v4596_v23 = vld [vmem:[#allocation3 + $0x198] sm:$0xff]  }
  0xb5   :  { %4278 = vmatprep.mubr.bf16.mxu0 %v4561_v24  ;;  %4458 = vmatprep.mubr.bf16.mxu1 %v4633_v1  ;;  %v4597_v24 = vld [vmem:[#allocation3 + $0x1a0] sm:$0xff]  }
  0xbc   :  { %4279 = vmatmul.mubr.bf16.gmra.mrb[32].mxu0 %v4562_v25  ;;  %4459 = vmatmul.mubr.bf16.gmra.mrb[32].mxu1 %v4634_v2  ;;  %v4657_v25 = vld [vmem:[#allocation3 + $0x3b0] sm:$0xff]  }
  0xbd   :  { %4282 = vmatprep.mubr.bf16.mxu0 %v4563_v26  ;;  %4462 = vmatprep.mubr.bf16.mxu1 %v4637_v5  ;;  %v4658_v26 = vld [vmem:[#allocation3 + $0x3b8] sm:$0xff]  }
  0xc4   :  { %4283 = vmatmul.mubr.bf16.gmra.mrb[36].mxu0 %v4564_v27  ;;  %4463 = vmatmul.mubr.bf16.gmra.mrb[36].mxu1 %v4638_v6  ;;  %v4598_v27 = vld [vmem:[#allocation3 + $0x1a8] sm:$0xff]   ;;  %v4608_v6 = vld [vmem:[#allocation3 + $0x1d8] sm:$0xff]  }
  0xc5   :  { %4286 = vmatprep.mubr.bf16.mxu0 %v4565_v28  ;;  %4466 = vmatprep.mubr.bf16.mxu1 %v4641_v9  ;;  %v4599_v28 = vld [vmem:[#allocation3 + $0x1b0] sm:$0xff]  }
  0xcc   :  { %4287 = vmatmul.mubr.bf16.gmra.mrb[40].mxu0 %v4566_v29  ;;  %4467 = vmatmul.mubr.bf16.gmra.mrb[40].mxu1 %v4642_v10  ;;  %v5124_v29 = vld [vmem:[%s5497_s2] ss:$0 sm:$0xff] }
  0xcd   :  { %4290 = vmatprep.mubr.bf16.mxu0 %v4567_v30  ;;  %4470 = vmatprep.mubr.bf16.mxu1 %v4645_v13  ;;  %v4661_v30 = vld [vmem:[#allocation3 + $0x3c0] sm:$0xff]  }
  0xd4   :  { %4291 = vmatmul.mubr.bf16.gmra.mrb[44].mxu0 %v4568_v31  ;;  %4471 = vmatmul.mubr.bf16.gmra.mrb[44].mxu1 %v4646_v14 }
  0xd5   :  { %4294 = vmatprep.mubr.bf16.mxu0 %v4569_v32  ;;  %4474 = vmatprep.mubr.bf16.mxu1 %v4649_v17  ;;  %v4662_v32 = vld [vmem:[#allocation3 + $0x3c8] sm:$0xff]  }
  0xdc   :  { %4295 = vmatmul.mubr.bf16.gmra.mrb[48].mxu0 %v4570_v33  ;;  %4475 = vmatmul.mubr.bf16.gmra.mrb[48].mxu1 %v4650_v18 }
  0xdd   :  { %4298 = vmatprep.mubr.bf16.mxu0 %v4571_v36  ;;  %4478 = vmatprep.mubr.bf16.mxu1 %v4653_v21 }
  0xe4   :  { %4299 = vmatmul.mubr.bf16.gmra.mrb[52].mxu0 %v4572_v37  ;;  %4479 = vmatmul.mubr.bf16.gmra.mrb[52].mxu1 %v4654_v22  ;;  %v4603_v37 = vld [vmem:[#allocation3 + $0x1c0] sm:$0xff]  }
  0xe5   :  { %4302 = vmatprep.mubr.bf16.mxu0 %v4573_v40  ;;  %4482 = vmatprep.mubr.bf16.mxu1 %v4657_v25 }
  0xec   :  { %4303 = vmatmul.mubr.bf16.gmra.mrb[56].mxu0 %v4574_v41  ;;  %4483 = vmatmul.mubr.bf16.gmra.mrb[56].mxu1 %v4658_v26  ;;  %v4612_v26 = vld [vmem:[#allocation3 + $0x1e8] sm:$0xff]  }
  0xed   :  { %4306 = vmatprep.mubr.bf16.mxu0 %v4575_v44  ;;  %4486 = vmatprep.mubr.bf16.mxu1 %v4661_v30  ;;  %v4665_v44 = vld [vmem:[#allocation3 + $0x3d0] sm:$0xff]  }
  0xf4   :  { %4307 = vmatmul.mubr.bf16.gmra.mrb[60].mxu0 %v4576_v45  ;;  %4487 = vmatmul.mubr.bf16.gmra.mrb[60].mxu1 %v4662_v32  ;;  %v4615_v32 = vld [vmem:[#allocation3 + $0x1f0] sm:$0xff]  }
  0xf5   :  { %4310 = vmatprep.mubr.bf16.mxu0 %v4577_v48  ;;  %v4666_v48 = vld [vmem:[#allocation3 + $0x3d8] sm:$0xff]   ;;  %4490 = vmatprep.mubr.bf16.mxu1 %v4665_v44 }
  0xfc   :  { %4311 = vmatmul.mubr.bf16.gmra.mrb[64].mxu0 %v4578_v49  ;;  %4491 = vmatmul.mubr.bf16.gmra.mrb[64].mxu1 %v4666_v48 }
  0xfd   :  { %4314 = vmatprep.mubr.bf16.mxu0 %v4579_v52 }
 0x104   :  { %4315 = vmatmul.mubr.bf16.gmra.mrb[68].mxu0 %v4580_v55  ;;  %v4607_v55 = vld [vmem:[#allocation3 + $0x1d0] sm:$0xff]  }
 0x105   :  { %4318 = vmatprep.mubr.bf16.mxu0 %v4581_v56 }
 0x10c   :  { %4319 = vmatmul.mubr.bf16.gmra.mrb[72].mxu0 %v4582_v59 }
 0x10d   :  { %4322 = vmatprep.mubr.bf16.mxu0 %v4583_v60 }
 0x114   :  { %4323 = vmatmul.mubr.bf16.gmra.mrb[76].mxu0 %v4584_v63 }
 0x115   :  { %4326 = vmatprep.mubr.bf16.mxu0 %v4585_v0  ;;  %v4669_v0 = vld [vmem:[#allocation3 + $0x3e0] sm:$0xff]  }
 0x116   :  { %4494 = vmatprep.mubr.bf16.mxu1 %v4669_v0 }
 0x11c   :  { %4327 = vmatmul.mubr.bf16.gmra.mrb[80].mxu0 %v4586_v3 }
 0x11d   :  { %4330 = vmatprep.mubr.bf16.mxu0 %v4587_v4  ;;  %v4670_v4 = vld [vmem:[#allocation3 + $0x3e8] sm:$0xff]  }
 0x11e   :  { %4495 = vmatmul.mubr.bf16.gmra.mrb[68].mxu1 %v4670_v4  ;;  %v4623_v4 = vld [vmem:[#allocation3 + $0x210] sm:$0xff]  }
 0x124   :  { %4331 = vmatmul.mubr.bf16.gmra.mrb[84].mxu0 %v4588_v7 }
 0x125   :  { %4334 = vmatprep.mubr.bf16.mxu0 %v4589_v8 }
 0x12c   :  { %4335 = vmatmul.mubr.bf16.gmra.mrb[88].mxu0 %v4590_v11  ;;  %v4611_v11 = vld [vmem:[#allocation3 + $0x1e0] sm:$0xff]  }
 0x12d   :  { %4338 = vmatprep.mubr.bf16.mxu0 %v4591_v12 }
 0x134   :  { %4339 = vmatmul.mubr.bf16.gmra.mrb[92].mxu0 %v4592_v15 }
 0x135   :  { %4342 = vmatprep.mubr.bf16.mxu0 %v4593_v16 }
 0x13c   :  { %4343 = vmatmul.mubr.bf16.gmra.mrb[96].mxu0 %v4594_v19 }
 0x13d   :  { %4346 = vmatprep.mubr.bf16.mxu0 %v4595_v20  ;;  %v4671_v20 = vld [vmem:[#allocation3 + $0x3f0] sm:$0xff]  }
 0x13e   :  { %4498 = vmatprep.mubr.bf16.mxu1 %v4671_v20 }
 0x144   :  { %4347 = vmatmul.mubr.bf16.gmra.mrb[100].mxu0 %v4596_v23 }
 0x145   :  { %4350 = vmatprep.mubr.bf16.mxu0 %v4597_v24  ;;  %v4672_v24 = vld [vmem:[#allocation3 + $0x3f8] sm:$0xff]  }
 0x146   :  { %4499 = vmatmul.mubr.bf16.gmra.mrb[72].mxu1 %v4672_v24 }
 0x14c   :  { %4351 = vmatmul.mubr.bf16.gmra.mrb[104].mxu0 %v4598_v27 }
 0x14d   :  { %4354 = vmatprep.mubr.bf16.mxu0 %v4599_v28 }
 0x14f   :  { %v4248_v31 = vpop.f32.mrb[0].mxu0 }
 0x150   :  { %v1236_v33 = vpop.f32.mrb[1].mxu0  ;;  %v1245_v39 = vadd.f32 %v4248_v31, %v5124_v29 }
 0x151   :  { %v1237_v35 = vadd.f32 %v5124_v29, %v1236_v33  ;;  %v4249_v36 = vpop.f32.mrb[2].mxu0 }
 0x152   :  { %v1239_v38 = vpop.f32.mrb[3].mxu0  ;;  %v1248_v42 = vadd.f32 %v4249_v36, %v5124_v29  ;;  %v2261_v45 = vmax.f32 %v1245_v39, 0.0 }
 0x153   :  { %v1240_v40 = vadd.f32 %v5124_v29, %v1239_v38  ;;  %v2259_v41 = vmax.f32 %v1237_v35, 0.0 }
 0x154   :  { %4355 = vmatmul.mubr.bf16.gmra.mrb[108].mxu0 %v4600_v34  ;;  %v2262_v51 = vmax.f32 %v1248_v42, 0.0 }
 0x155   :  { %v2260_v43 = vmax.f32 %v1240_v40, 0.0  ;;  %4358 = vmatprep.mubr.bf16.mxu0 %v4603_v37 }
 0x157   :  { %v2516_v46 = vadd.f32 %v2260_v43, %v2259_v41  ;;  %v4252_v47 = vpop.f32.mrb[4].mxu0 }
 0x158   :  { %v1252_v49 = vpop.f32.mrb[5].mxu0  ;;  %v1261_v57 = vadd.f32 %v4252_v47, %v5124_v29 }
 0x159   :  { %v2517_v52 = vadd.f32 %v2516_v46, %v2261_v45  ;;  %v1253_v53 = vadd.f32 %v5124_v29, %v1252_v49  ;;  %v4253_v54 = vpop.f32.mrb[6].mxu0  ;;  %v4616_v45 = vld [vmem:[#allocation3 + $0x1f8] sm:$0xff]  }
 0x15a   :  { %v1255_v56 = vpop.f32.mrb[7].mxu0  ;;  %v1264_v62 = vadd.f32 %v4253_v54, %v5124_v29  ;;  %v2265_v1 = vmax.f32 %v1261_v57, 0.0 }
 0x15b   :  { %v2263_v58 = vmax.f32 %v1253_v53, 0.0  ;;  %v2518_v59 = vadd.f32 %v2517_v52, %v2262_v51  ;;  %v1256_v60 = vadd.f32 %v5124_v29, %v1255_v56 }
 0x15c   :  { %4359 = vmatmul.mubr.bf16.gmra.mrb[112].mxu0 %v4604_v50  ;;  %v2266_v7 = vmax.f32 %v1264_v62, 0.0  ;;  %v4619_v50 = vld [vmem:[#allocation3 + $0x200] sm:$0xff]  }
 0x15d   :  { %v2519_v61 = vadd.f32 %v2518_v59, %v2263_v58  ;;  %v2264_v63 = vmax.f32 %v1256_v60, 0.0  ;;  %4362 = vmatprep.mubr.bf16.mxu0 %v4607_v55 }
 0x15f   :  { %v2520_v2 = vadd.f32 %v2519_v61, %v2264_v63  ;;  %v4256_v3 = vpop.f32.mrb[8].mxu0  ;;  %v4620_v63 = vld [vmem:[#allocation3 + $0x208] sm:$0xff]  }
 0x160   :  { %v1268_v5 = vpop.f32.mrb[9].mxu0  ;;  %v1277_v13 = vadd.f32 %v4256_v3, %v5124_v29 }
 0x161   :  { %v2521_v8 = vadd.f32 %v2520_v2, %v2265_v1  ;;  %v1269_v9 = vadd.f32 %v5124_v29, %v1268_v5  ;;  %v4257_v10 = vpop.f32.mrb[10].mxu0 }
 0x162   :  { %v1271_v12 = vpop.f32.mrb[11].mxu0  ;;  %v1280_v18 = vadd.f32 %v4257_v10, %v5124_v29  ;;  %v2269_v21 = vmax.f32 %v1277_v13, 0.0 }
 0x163   :  { %v2267_v14 = vmax.f32 %v1269_v9, 0.0  ;;  %v2522_v15 = vadd.f32 %v2521_v8, %v2266_v7  ;;  %v1272_v16 = vadd.f32 %v5124_v29, %v1271_v12 }
 0x164   :  { %4363 = vmatmul.mubr.bf16.gmra.mrb[116].mxu0 %v4608_v6  ;;  %v2270_v27 = vmax.f32 %v1280_v18, 0.0 }
 0x165   :  { %v2523_v17 = vadd.f32 %v2522_v15, %v2267_v14  ;;  %v2268_v19 = vmax.f32 %v1272_v16, 0.0  ;;  %4366 = vmatprep.mubr.bf16.mxu0 %v4611_v11 }
 0x167   :  { %v2524_v22 = vadd.f32 %v2523_v17, %v2268_v19  ;;  %v4260_v23 = vpop.f32.mrb[12].mxu0  ;;  %v4624_v17 = vld [vmem:[#allocation3 + $0x218] sm:$0xff]  }
 0x168   :  { %v1284_v25 = vpop.f32.mrb[13].mxu0  ;;  %v1293_v34 = vadd.f32 %v4260_v23, %v5124_v29 }
 0x169   :  { %v2525_v28 = vadd.f32 %v2524_v22, %v2269_v21  ;;  %v1285_v30 = vadd.f32 %v5124_v29, %v1284_v25  ;;  %v4261_v31 = vpop.f32.mrb[14].mxu0  ;;  %v4627_v22 = vld [vmem:[#allocation3 + $0x220] sm:$0xff]  }
 0x16a   :  { %v1287_v33 = vpop.f32.mrb[15].mxu0  ;;  %v1296_v39 = vadd.f32 %v4261_v31, %v5124_v29  ;;  %v2273_v41 = vmax.f32 %v1293_v34, 0.0 }
 0x16b   :  { %v2271_v35 = vmax.f32 %v1285_v30, 0.0  ;;  %v2526_v36 = vadd.f32 %v2525_v28, %v2270_v27  ;;  %v1288_v37 = vadd.f32 %v5124_v29, %v1287_v33 }
 0x16c   :  { %4367 = vmatmul.mubr.bf16.gmra.mrb[120].mxu0 %v4612_v26  ;;  %v2274_v46 = vmax.f32 %v1296_v39, 0.0 }
 0x16d   :  { %v2527_v38 = vadd.f32 %v2526_v36, %v2271_v35  ;;  %v2272_v40 = vmax.f32 %v1288_v37, 0.0  ;;  %4370 = vmatprep.mubr.bf16.mxu0 %v4615_v32  ;;  %v4628_v36 = vld [vmem:[#allocation3 + $0x228] sm:$0xff]  }
 0x16f   :  { %v2528_v42 = vadd.f32 %v2527_v38, %v2272_v40  ;;  %v4264_v43 = vpop.f32.mrb[16].mxu0 }
 0x170   :  { %v1300_v44 = vpop.f32.mrb[17].mxu0  ;;  %v1309_v52 = vadd.f32 %v4264_v43, %v5124_v29 }
 0x171   :  { %v2529_v47 = vadd.f32 %v2528_v42, %v2273_v41  ;;  %v1301_v48 = vadd.f32 %v5124_v29, %v1300_v44  ;;  %v4265_v49 = vpop.f32.mrb[18].mxu0  ;;  %v4631_v41 = vld [vmem:[#allocation3 + $0x230] sm:$0xff]  }
 0x172   :  { %v1303_v51 = vpop.f32.mrb[19].mxu0  ;;  %v1312_v57 = vadd.f32 %v4265_v49, %v5124_v29  ;;  %v2277_v59 = vmax.f32 %v1309_v52, 0.0 }
 0x173   :  { %v2275_v53 = vmax.f32 %v1301_v48, 0.0  ;;  %v2530_v54 = vadd.f32 %v2529_v47, %v2274_v46  ;;  %v1304_v55 = vadd.f32 %v5124_v29, %v1303_v51 }
 0x174   :  { %4371 = vmatmul.mubr.bf16.gmra.mrb[124].mxu0 %v4616_v45  ;;  %v2278_v0 = vmax.f32 %v1312_v57, 0.0 }
 0x175   :  { %v2531_v56 = vadd.f32 %v2530_v54, %v2275_v53  ;;  %v2276_v58 = vmax.f32 %v1304_v55, 0.0  ;;  %4374 = vmatprep.mubr.bf16.mxu0 %v4619_v50  ;;  %v4632_v54 = vld [vmem:[#allocation3 + $0x238] sm:$0xff]  }
 0x177   :  { %v2532_v60 = vadd.f32 %v2531_v56, %v2276_v58  ;;  %v4268_v61 = vpop.f32.mrb[20].mxu0 }
 0x178   :  { %v1316_v62 = vpop.f32.mrb[21].mxu0  ;;  %v1325_v6 = vadd.f32 %v4268_v61, %v5124_v29 }
 0x179   :  { %v2533_v1 = vadd.f32 %v2532_v60, %v2277_v59  ;;  %v1317_v2 = vadd.f32 %v5124_v29, %v1316_v62  ;;  %v4269_v3 = vpop.f32.mrb[22].mxu0  ;;  %v4635_v59 = vld [vmem:[#allocation3 + $0x240] sm:$0xff]  }
 0x17a   :  { %v1319_v5 = vpop.f32.mrb[23].mxu0  ;;  %v1328_v11 = vadd.f32 %v4269_v3, %v5124_v29  ;;  %v2281_v13 = vmax.f32 %v1325_v6, 0.0 }
 0x17b   :  { %v2279_v7 = vmax.f32 %v1317_v2, 0.0  ;;  %v2534_v8 = vadd.f32 %v2533_v1, %v2278_v0  ;;  %v1320_v9 = vadd.f32 %v5124_v29, %v1319_v5 }
 0x17c   :  { %4375 = vmatmul.mubr.bf16.gmra.mrb[128].mxu0 %v4620_v63  ;;  %v2282_v18 = vmax.f32 %v1328_v11, 0.0 }
 0x17d   :  { %v2535_v10 = vadd.f32 %v2534_v8, %v2279_v7  ;;  %v2280_v12 = vmax.f32 %v1320_v9, 0.0  ;;  %4378 = vmatprep.mubr.bf16.mxu0 %v4623_v4  ;;  %v4636_v7 = vld [vmem:[#allocation3 + $0x248] sm:$0xff]  }
 0x17f   :  { %v2536_v14 = vadd.f32 %v2535_v10, %v2280_v12  ;;  %v4272_v15 = vpop.f32.mrb[24].mxu0  ;;  %v4639_v12 = vld [vmem:[#allocation3 + $0x250] sm:$0xff]  }
 0x180   :  { %v1332_v16 = vpop.f32.mrb[25].mxu0  ;;  %v1341_v24 = vadd.f32 %v4272_v15, %v5124_v29 }
 0x181   :  { %v2537_v19 = vadd.f32 %v2536_v14, %v2281_v13  ;;  %v1333_v20 = vadd.f32 %v5124_v29, %v1332_v16  ;;  %v4273_v21 = vpop.f32.mrb[26].mxu0 }
 0x182   :  { %v1335_v23 = vpop.f32.mrb[27].mxu0  ;;  %v1344_v30 = vadd.f32 %v4273_v21, %v5124_v29  ;;  %v2285_v32 = vmax.f32 %v1341_v24, 0.0 }
 0x183   :  { %v2283_v25 = vmax.f32 %v1333_v20, 0.0  ;;  %v2538_v26 = vadd.f32 %v2537_v19, %v2282_v18  ;;  %v1336_v27 = vadd.f32 %v5124_v29, %v1335_v23 }
 0x184   :  { %4379 = vmatmul.mubr.bf16.gmra.mrb[132].mxu0 %v4624_v17  ;;  %v2286_v37 = vmax.f32 %v1344_v30, 0.0 }
 0x185   :  { %v2539_v28 = vadd.f32 %v2538_v26, %v2283_v25  ;;  %v2284_v31 = vmax.f32 %v1336_v27, 0.0  ;;  %4382 = vmatprep.mubr.bf16.mxu0 %v4627_v22  ;;  %v4640_v25 = vld [vmem:[#allocation3 + $0x258] sm:$0xff]  }
 0x187   :  { %v2540_v33 = vadd.f32 %v2539_v28, %v2284_v31  ;;  %v4276_v34 = vpop.f32.mrb[28].mxu0  ;;  %v4643_v31 = vld [vmem:[#allocation3 + $0x260] sm:$0xff]  }
 0x188   :  { %v1348_v35 = vpop.f32.mrb[29].mxu0  ;;  %v1357_v43 = vadd.f32 %v4276_v34, %v5124_v29 }
 0x189   :  { %v2541_v38 = vadd.f32 %v2540_v33, %v2285_v32  ;;  %v1349_v39 = vadd.f32 %v5124_v29, %v1348_v35  ;;  %v4277_v40 = vpop.f32.mrb[30].mxu0 }
 0x18a   :  { %v1351_v42 = vpop.f32.mrb[31].mxu0  ;;  %v1360_v48 = vadd.f32 %v4277_v40, %v5124_v29  ;;  %v2289_v50 = vmax.f32 %v1357_v43, 0.0 }
 0x18b   :  { %v2287_v44 = vmax.f32 %v1349_v39, 0.0  ;;  %v2542_v45 = vadd.f32 %v2541_v38, %v2286_v37  ;;  %v1352_v46 = vadd.f32 %v5124_v29, %v1351_v42 }
 0x18c   :  { %4383 = vmatmul.mubr.bf16.gmra.mrb[136].mxu0 %v4628_v36  ;;  %v2290_v55 = vmax.f32 %v1360_v48, 0.0 }
 0x18d   :  { %v2543_v47 = vadd.f32 %v2542_v45, %v2287_v44  ;;  %v2288_v49 = vmax.f32 %v1352_v46, 0.0  ;;  %4386 = vmatprep.mubr.bf16.mxu0 %v4631_v41  ;;  %v4644_v44 = vld [vmem:[#allocation3 + $0x268] sm:$0xff]  }
 0x18f   :  { %v2544_v51 = vadd.f32 %v2543_v47, %v2288_v49  ;;  %v4280_v52 = vpop.f32.mrb[32].mxu0  ;;  %v4647_v49 = vld [vmem:[#allocation3 + $0x270] sm:$0xff]  }
 0x190   :  { %v1364_v53 = vpop.f32.mrb[33].mxu0  ;;  %v1373_v62 = vadd.f32 %v4280_v52, %v5124_v29 }
 0x191   :  { %v2545_v56 = vadd.f32 %v2544_v51, %v2289_v50  ;;  %v1365_v57 = vadd.f32 %v5124_v29, %v1364_v53  ;;  %v4281_v58 = vpop.f32.mrb[34].mxu0 }
 0x192   :  { %v1367_v60 = vpop.f32.mrb[35].mxu0  ;;  %v1376_v1 = vadd.f32 %v4281_v58, %v5124_v29  ;;  %v2293_v3 = vmax.f32 %v1373_v62, 0.0 }
 0x193   :  { %v5159_v61 = vadd.f32 %v2545_v56, %v2290_v55  ;;  %v1368_v63 = vadd.f32 %v5124_v29, %v1367_v60  ;;  %v2291_v0 = vmax.f32 %v1365_v57, 0.0 }
 0x194   :  { %4387 = vmatmul.mubr.bf16.gmra.mrb[140].mxu0 %v4632_v54  ;;  %v2294_v8 = vmax.f32 %v1376_v1, 0.0 }
 0x195   :  { %v2292_v2 = vmax.f32 %v1368_v63, 0.0  ;;  %4390 = vmatprep.mubr.bf16.mxu0 %v4635_v59  ;;  %v4648_v63 = vld [vmem:[#allocation3 + $0x278] sm:$0xff]  }
 0x197   :  { %v2553_v4 = vadd.f32 %v2292_v2, %v2291_v0  ;;  %v4284_v5 = vpop.f32.mrb[36].mxu0 }
 0x198   :  { %v1380_v6 = vpop.f32.mrb[37].mxu0  ;;  %v1389_v14 = vadd.f32 %v4284_v5, %v5124_v29 }
 0x199   :  { %v2554_v9 = vadd.f32 %v2553_v4, %v2293_v3  ;;  %v1381_v10 = vadd.f32 %v5124_v29, %v1380_v6  ;;  %v4285_v11 = vpop.f32.mrb[38].mxu0  ;;  %v4651_v4 = vld [vmem:[#allocation3 + $0x280] sm:$0xff]  }
 0x19a   :  { %v1383_v13 = vpop.f32.mrb[39].mxu0  ;;  %v1392_v19 = vadd.f32 %v4285_v11, %v5124_v29  ;;  %v2297_v21 = vmax.f32 %v1389_v14, 0.0 }
 0x19b   :  { %v2295_v15 = vmax.f32 %v1381_v10, 0.0  ;;  %v2555_v16 = vadd.f32 %v2554_v9, %v2294_v8  ;;  %v1384_v17 = vadd.f32 %v5124_v29, %v1383_v13  ;;  %v5180_v13 = vpop.f32.mrb[0].mxu1 }
 0x19c   :  { %4391 = vmatmul.mubr.bf16.gmra.mrb[144].mxu0 %v4636_v7  ;;  %v2298_v26 = vmax.f32 %v1392_v19, 0.0  ;;  %v4652_v19 = vld [vmem:[#allocation3 + $0x288] sm:$0xff]  }
 0x19d   :  { %v2556_v18 = vadd.f32 %v2555_v16, %v2295_v15  ;;  %v2296_v20 = vmax.f32 %v1384_v17, 0.0  ;;  %4394 = vmatprep.mubr.bf16.mxu0 %v4639_v12  ;;  %v5182_v17 = vpop.f32.mrb[1].mxu1 }
 0x19f   :  { %v2557_v22 = vadd.f32 %v2556_v18, %v2296_v20  ;;  %v4288_v23 = vpop.f32.mrb[40].mxu0  ;;  %v5184_v20 = vpop.f32.mrb[2].mxu1 }
 0x1a0   :  { %v1396_v24 = vpop.f32.mrb[41].mxu0  ;;  %v1405_v33 = vadd.f32 %v4288_v23, %v5124_v29 }
 0x1a1   :  { %v2558_v27 = vadd.f32 %v2557_v22, %v2297_v21  ;;  %v1397_v28 = vadd.f32 %v5124_v29, %v1396_v24  ;;  %v4289_v30 = vpop.f32.mrb[42].mxu0 }
 0x1a2   :  { %v1399_v32 = vpop.f32.mrb[43].mxu0  ;;  %v1408_v38 = vadd.f32 %v4289_v30, %v5124_v29  ;;  %v2301_v40 = vmax.f32 %v1405_v33, 0.0 }
 0x1a3   :  { %v2299_v34 = vmax.f32 %v1397_v28, 0.0  ;;  %v2559_v35 = vadd.f32 %v2558_v27, %v2298_v26  ;;  %v1400_v36 = vadd.f32 %v5124_v29, %v1399_v32  ;;  %v5187_v26 = vpop.f32.mrb[3].mxu1 }
 0x1a4   :  { %4395 = vmatmul.mubr.bf16.gmra.mrb[148].mxu0 %v4640_v25  ;;  %v2302_v45 = vmax.f32 %v1408_v38, 0.0  ;;  %v4655_v25 = vld [vmem:[#allocation3 + $0x290] sm:$0xff]   ;;  %v5191_v33 = vpop.f32.mrb[4].mxu1 }
 0x1a5   :  { %v2560_v37 = vadd.f32 %v2559_v35, %v2299_v34  ;;  %v2300_v39 = vmax.f32 %v1400_v36, 0.0  ;;  %4398 = vmatprep.mubr.bf16.mxu0 %v4643_v31 }
 0x1a7   :  { %v2561_v41 = vadd.f32 %v2560_v37, %v2300_v39  ;;  %v4292_v42 = vpop.f32.mrb[44].mxu0  ;;  %v5194_v37 = vpop.f32.mrb[5].mxu1 }
 0x1a8   :  { %v1412_v43 = vpop.f32.mrb[45].mxu0  ;;  %v1421_v51 = vadd.f32 %v4292_v42, %v5124_v29  ;;  %v5196_v38 = vpop.f32.mrb[6].mxu1 }
 0x1a9   :  { %v2562_v46 = vadd.f32 %v2561_v41, %v2301_v40  ;;  %v1413_v47 = vadd.f32 %v5124_v29, %v1412_v43  ;;  %v4293_v48 = vpop.f32.mrb[46].mxu0  ;;  %v5198_v42 = vpop.f32.mrb[7].mxu1 }
 0x1aa   :  { %v1415_v50 = vpop.f32.mrb[47].mxu0  ;;  %v1424_v56 = vadd.f32 %v4293_v48, %v5124_v29  ;;  %v2305_v58 = vmax.f32 %v1421_v51, 0.0 }
 0x1ab   :  { %v2303_v52 = vmax.f32 %v1413_v47, 0.0  ;;  %v2563_v53 = vadd.f32 %v2562_v46, %v2302_v45  ;;  %v1416_v54 = vadd.f32 %v5124_v29, %v1415_v50  ;;  %v5200_v45 = vpop.f32.mrb[8].mxu1  ;;  %v4659_v50 = vld [vmem:[#allocation3 + $0x2a0] sm:$0xff]  }
 0x1ac   :  { %4399 = vmatmul.mubr.bf16.gmra.mrb[152].mxu0 %v4644_v44  ;;  %v2306_v0 = vmax.f32 %v1424_v56, 0.0  ;;  %v4656_v44 = vld [vmem:[#allocation3 + $0x298] sm:$0xff]   ;;  %v5203_v51 = vpop.f32.mrb[9].mxu1 }
 0x1ad   :  { %v2564_v55 = vadd.f32 %v2563_v53, %v2303_v52  ;;  %v2304_v57 = vmax.f32 %v1416_v54, 0.0  ;;  %4402 = vmatprep.mubr.bf16.mxu0 %v4647_v49  ;;  %v5205_v53 = vpop.f32.mrb[10].mxu1 }
 0x1af   :  { %v2565_v59 = vadd.f32 %v2564_v55, %v2304_v57  ;;  %v4296_v60 = vpop.f32.mrb[48].mxu0 }
 0x1b0   :  { %v1428_v62 = vpop.f32.mrb[49].mxu0  ;;  %v1437_v6 = vadd.f32 %v4296_v60, %v5124_v29 }
 0x1b1   :  { %v2566_v1 = vadd.f32 %v2565_v59, %v2305_v58  ;;  %v1429_v2 = vadd.f32 %v5124_v29, %v1428_v62  ;;  %v4297_v3 = vpop.f32.mrb[50].mxu0  ;;  %v5209_v58 = vpop.f32.mrb[11].mxu1 }
 0x1b2   :  { %v1431_v5 = vpop.f32.mrb[51].mxu0  ;;  %v1440_v11 = vadd.f32 %v4297_v3, %v5124_v29  ;;  %v2309_v14 = vmax.f32 %v1437_v6, 0.0  ;;  %v4440_v59 = vpop.f32.mrb[12].mxu1 }
 0x1b3   :  { %v2307_v7 = vmax.f32 %v1429_v2, 0.0  ;;  %v2567_v8 = vadd.f32 %v2566_v1, %v2306_v0  ;;  %v1432_v9 = vadd.f32 %v5124_v29, %v1431_v5  ;;  %v2004_v0 = vpop.f32.mrb[13].mxu1 }
 0x1b4   :  { %4403 = vmatmul.mubr.bf16.gmra.mrb[156].mxu0 %v4648_v63  ;;  %v2310_v21 = vmax.f32 %v1440_v11, 0.0  ;;  %v4441_v1 = vpop.f32.mrb[14].mxu1 }
 0x1b5   :  { %v2568_v10 = vadd.f32 %v2567_v8, %v2307_v7  ;;  %v2308_v12 = vmax.f32 %v1432_v9, 0.0  ;;  %4406 = vmatprep.mubr.bf16.mxu0 %v4651_v4  ;;  %v2007_v5 = vpop.f32.mrb[15].mxu1  ;;  %v4660_v7 = vld [vmem:[#allocation3 + $0x2a8] sm:$0xff]   ;;  %v2005_v8 = vadd.f32 %v5124_v29, %v2004_v0 }
 0x1b7   :  { %v2569_v15 = vadd.f32 %v2568_v10, %v2308_v12  ;;  %v4300_v16 = vpop.f32.mrb[52].mxu0 }
 0x1b8   :  { %v1444_v18 = vpop.f32.mrb[53].mxu0  ;;  %v1453_v28 = vadd.f32 %v4300_v16, %v5124_v29  ;;  %v2547_v16 = vrot.slane %v5159_v61, 4 }
 0x1b9   :  { %v2570_v22 = vadd.f32 %v2569_v15, %v2309_v14  ;;  %v1445_v23 = vadd.f32 %v5124_v29, %v1444_v18  ;;  %v4301_v24 = vpop.f32.mrb[54].mxu0  ;;  %v4663_v14 = vld [vmem:[#allocation3 + $0x2b0] sm:$0xff]   ;;  %v2008_v15 = vadd.f32 %v5124_v29, %v2007_v5 }
 0x1ba   :  { %v1447_v27 = vpop.f32.mrb[55].mxu0  ;;  %v1456_v35 = vadd.f32 %v4301_v24, %v5124_v29  ;;  %v2313_v39 = vmax.f32 %v1453_v28, 0.0  ;;  %v2016_v28 = vadd.f32 %v4441_v1, %v5124_v29 }
 0x1bb   :  { %v2311_v30 = vmax.f32 %v1445_v23, 0.0  ;;  %v2571_v31 = vadd.f32 %v2570_v22, %v2310_v21  ;;  %v1448_v32 = vadd.f32 %v5124_v29, %v1447_v27  ;;  %v2013_v21 = vadd.f32 %v4440_v59, %v5124_v29 }
 0x1bc   :  { %4407 = vmatmul.mubr.bf16.gmra.mrb[160].mxu0 %v4652_v19  ;;  %v2314_v46 = vmax.f32 %v1456_v35, 0.0  ;;  %v2452_v35 = vmax.f32 %v2008_v15, 0.0 }
 0x1bd   :  { %v2572_v34 = vadd.f32 %v2571_v31, %v2311_v30  ;;  %v2312_v36 = vmax.f32 %v1448_v32, 0.0  ;;  %4410 = vmatprep.mubr.bf16.mxu0 %v4655_v25  ;;  %v2451_v25 = vmax.f32 %v2005_v8, 0.0  ;;  %v4444_v30 = vpop.f32.mrb[16].mxu1 }
 0x1bf   :  { %v2573_v40 = vadd.f32 %v2572_v34, %v2312_v36  ;;  %v4304_v41 = vpop.f32.mrb[56].mxu0  ;;  %v2453_v34 = vmax.f32 %v2013_v21, 0.0  ;;  %v2020_v36 = vpop.f32.mrb[17].mxu1 }
 0x1c0   :  { %v1460_v43 = vpop.f32.mrb[57].mxu0  ;;  %v1469_v54 = vadd.f32 %v4304_v41, %v5124_v29  ;;  %v4445_v41 = vpop.f32.mrb[18].mxu1 }
 0x1c1   :  { %v2574_v47 = vadd.f32 %v2573_v40, %v2313_v39  ;;  %v1461_v48 = vadd.f32 %v5124_v29, %v1460_v43  ;;  %v4305_v49 = vpop.f32.mrb[58].mxu0  ;;  %v2548_v39 = vadd.f32 %v2547_v16, %v5159_v61  ;;  %v2021_v40 = vadd.f32 %v5124_v29, %v2020_v36 }
 0x1c2   :  { %v1463_v52 = vpop.f32.mrb[59].mxu0  ;;  %v1472_v62 = vadd.f32 %v4305_v49, %v5124_v29  ;;  %v2317_v2 = vmax.f32 %v1469_v54, 0.0  ;;  %v2023_v49 = vpop.f32.mrb[19].mxu1  ;;  %v4664_v54 = vld [vmem:[#allocation3 + $0x2b8] sm:$0xff]  }
 0x1c3   :  { %v2315_v55 = vmax.f32 %v1461_v48, 0.0  ;;  %v2575_v56 = vadd.f32 %v2574_v47, %v2314_v46  ;;  %v1464_v57 = vadd.f32 %v5124_v29, %v1463_v52  ;;  %v2454_v47 = vmax.f32 %v2016_v28, 0.0 }
 0x1c4   :  { %4411 = vmatmul.mubr.bf16.gmra.mrb[164].mxu0 %v4656_v44  ;;  %v2318_v9 = vmax.f32 %v1472_v62, 0.0  ;;  %v2738_v48 = vadd.f32 %v2452_v35, %v2451_v25  ;;  %v2455_v62 = vmax.f32 %v2021_v40, 0.0 }
 0x1c5   :  { %v2576_v60 = vadd.f32 %v2575_v56, %v2315_v55  ;;  %v2316_v63 = vmax.f32 %v1464_v57, 0.0  ;;  %4414 = vmatprep.mubr.bf16.mxu0 %v4659_v50  ;;  %v2024_v55 = vadd.f32 %v5124_v29, %v2023_v49 }
 0x1c6   :  { %v2739_v61 = vadd.f32 %v2738_v48, %v2453_v34 }
 0x1c7   :  { %v2577_v3 = vadd.f32 %v2576_v60, %v2316_v63  ;;  %v4308_v4 = vpop.f32.mrb[60].mxu0  ;;  %v4667_v60 = vld [vmem:[#allocation3 + $0x2c0] sm:$0xff]   ;;  %v2549_v63 = vrot.slane %v2548_v39, 2 }
 0x1c8   :  { %v1476_v6 = vpop.f32.mrb[61].mxu0  ;;  %v1485_v18 = vadd.f32 %v4308_v4, %v5124_v29  ;;  %v2740_v5 = vadd.f32 %v2739_v61, %v2454_v47 }
 0x1c9   :  { %v2578_v10 = vadd.f32 %v2577_v3, %v2317_v2  ;;  %v1477_v11 = vadd.f32 %v5124_v29, %v1476_v6  ;;  %v4309_v12 = vpop.f32.mrb[62].mxu0  ;;  %v2029_v2 = vadd.f32 %v4444_v30, %v5124_v29  ;;  %v2456_v6 = vmax.f32 %v2024_v55, 0.0 }
 0x1ca   :  { %v1479_v19 = vpop.f32.mrb[63].mxu0  ;;  %v1488_v27 = vadd.f32 %v4309_v12, %v5124_v29  ;;  %v2321_v43 = vmax.f32 %v1485_v18, 0.0  ;;  %v2741_v15 = vadd.f32 %v2740_v5, %v2455_v62  ;;  %v2550_v18 = vadd.f32 %v2549_v63, %v2548_v39 }
 0x1cb   :  { %v2319_v22 = vmax.f32 %v1477_v11, 0.0  ;;  %v2579_v23 = vadd.f32 %v2578_v10, %v2318_v9  ;;  %v1480_v24 = vadd.f32 %v5124_v29, %v1479_v19  ;;  %v2032_v9 = vadd.f32 %v4445_v41, %v5124_v29  ;;  %v4448_v10 = vpop.f32.mrb[20].mxu1 }
 0x1cc   :  { %4415 = vmatmul.mubr.bf16.gmra.mrb[168].mxu0 %v4660_v7  ;;  %v2322_v50 = vmax.f32 %v1488_v27, 0.0  ;;  %v2036_v16 = vpop.f32.mrb[21].mxu1  ;;  %v2742_v27 = vadd.f32 %v2741_v15, %v2456_v6  ;;  %v2045_v48 = vadd.f32 %v4448_v10, %v5124_v29 }
 0x1cd   :  { %v2580_v31 = vadd.f32 %v2579_v23, %v2319_v22  ;;  %v2320_v32 = vmax.f32 %v1480_v24, 0.0  ;;  %4418 = vmatprep.mubr.bf16.mxu0 %v4663_v14  ;;  %v2457_v14 = vmax.f32 %v2029_v2, 0.0  ;;  %v2037_v19 = vadd.f32 %v5124_v29, %v2036_v16  ;;  %v4449_v21 = vpop.f32.mrb[22].mxu1 }
 0x1ce   :  { %v2039_v28 = vpop.f32.mrb[23].mxu1  ;;  %v2458_v34 = vmax.f32 %v2032_v9, 0.0  ;;  %v2461_v2 = vmax.f32 %v2045_v48, 0.0 }
 0x1cf   :  { %v2581_v44 = vadd.f32 %v2580_v31, %v2320_v32  ;;  %v4312_v46 = vpop.f32.mrb[64].mxu0  ;;  %v4668_v32 = vld [vmem:[#allocation3 + $0x2c8] sm:$0xff]   ;;  %v2040_v35 = vadd.f32 %v5124_v29, %v2039_v28  ;;  %v2459_v49 = vmax.f32 %v2037_v19, 0.0 }
 0x1d0   :  { %v1492_v52 = vpop.f32.mrb[65].mxu0  ;;  %v1501_v0 = vadd.f32 %v4312_v46, %v5124_v29 }
 0x1d1   :  { %v2582_v56 = vadd.f32 %v2581_v44, %v2321_v43  ;;  %v1493_v57 = vadd.f32 %v5124_v29, %v1492_v52  ;;  %v4313_v59 = vpop.f32.mrb[66].mxu0  ;;  %v2743_v43 = vadd.f32 %v2742_v27, %v2457_v14  ;;  %v2551_v44 = vrot.slane %v2550_v18, 1  ;;  %v4675_v27 = vld [vmem:[#allocation8 + $0x4] ss:$16 sps:$4 sm:$0xff]  }
 0x1d2   :  { %v1495_v1 = vpop.f32.mrb[67].mxu0  ;;  %v1504_v8 = vadd.f32 %v4313_v59, %v5124_v29  ;;  %v2325_v23 = vmax.f32 %v1501_v0, 0.0  ;;  %v2460_v59 = vmax.f32 %v2040_v35, 0.0  ;;  %3057 = vmatprep.subr.bf16.mxu1 %v4675_v27 }
 0x1d3   :  { %v2583_v3 = vadd.f32 %v2582_v56, %v2322_v50  ;;  %v1496_v4 = vadd.f32 %v5124_v29, %v1495_v1  ;;  %v2323_v7 = vmax.f32 %v1493_v57, 0.0  ;;  %v2744_v56 = vadd.f32 %v2743_v43, %v2458_v34 }
 0x1d4   :  { %4419 = vmatmul.mubr.bf16.gmra.mrb[172].mxu0 %v4664_v54  ;;  %v2326_v30 = vmax.f32 %v1504_v8, 0.0  ;;  %v2048_v57 = vadd.f32 %v4449_v21, %v5124_v29  ;;  %v2552_v6 = vadd.f32 %v2551_v44, %v2550_v18 }
 0x1d5   :  { %v2584_v11 = vrot.slane %v2583_v3, 4  ;;  %v2324_v12 = vmax.f32 %v1496_v4, 0.0  ;;  %4422 = vmatprep.mubr.bf16.mxu0 %v4667_v60  ;;  %v4452_v60 = vpop.f32.mrb[24].mxu1 }
 0x1d6   :  { %v2052_v1 = vpop.f32.mrb[25].mxu1  ;;  %v2462_v14 = vmax.f32 %v2048_v57, 0.0 }
 0x1d7   :  { %v2585_v22 = vadd.f32 %v2584_v11, %v2583_v3  ;;  %v2590_v24 = vadd.f32 %v2324_v12, %v2323_v7  ;;  %v4316_v25 = vpop.f32.mrb[68].mxu0  ;;  %v2745_v3 = vadd.f32 %v2744_v56, %v2459_v49  ;;  %v2053_v4 = vadd.f32 %v5124_v29, %v2052_v1  ;;  %v4453_v5 = vpop.f32.mrb[26].mxu1 }
 0x1d8   :  { %v1508_v31 = vpop.f32.mrb[69].mxu0  ;;  %v1517_v46 = vadd.f32 %v4316_v25, %v5124_v29  ;;  %v2055_v11 = vpop.f32.mrb[27].mxu1  ;;  %v4673_v25 = vld [vmem:[#allocation8] ss:$16 sps:$4 sm:$0xff]  }
 0x1d9   :  { %v2586_v36 = vrot.slane %v2585_v22, 2  ;;  %v2591_v40 = vadd.f32 %v2590_v24, %v2325_v23  ;;  %v1509_v41 = vadd.f32 %v5124_v29, %v1508_v31  ;;  %v4317_v39 = vpop.f32.mrb[70].mxu0  ;;  %v2746_v15 = vadd.f32 %v2745_v3, %v2460_v59  ;;  %3058 = vmatpush1.bf16.msra.mxu1 %v4673_v25  ;;  %v4456_v43 = vpop.f32.mrb[28].mxu1 }
 0x1da   :  { %v1511_v47 = vpop.f32.mrb[71].mxu0  ;;  %v1520_v63 = vadd.f32 %v4317_v39, %v5124_v29  ;;  %v2329_v8 = vmax.f32 %v1517_v46, 0.0  ;;  %v2056_v16 = vadd.f32 %v5124_v29, %v2055_v11  ;;  %v2463_v31 = vmax.f32 %v2053_v4, 0.0  ;;  %v2068_v48 = vpop.f32.mrb[29].mxu1  ;;  %v4676_v4 = vld [vmem:[#allocation8 + $0x20] ss:$16 sps:$4 sm:$0xff]  }
 0x1db   :  { %v2587_v50 = vadd.f32 %v2586_v36, %v2585_v22  ;;  %v2327_v52 = vmax.f32 %v1509_v41, 0.0  ;;  %v2592_v54 = vadd.f32 %v2591_v40, %v2326_v30  ;;  %v1512_v55 = vadd.f32 %v5124_v29, %v1511_v47 }
 0x1dc   :  { %4423 = vmatmul.mubr.bf16.gmra.mrb[176].mxu0 %v4668_v32  ;;  %v2330_v21 = vmax.f32 %v1520_v63, 0.0  ;;  %v2747_v28 = vadd.f32 %v2746_v15, %v2461_v2  ;;  %v2061_v30 = vadd.f32 %v4452_v60, %v5124_v29  ;;  %v2064_v41 = vadd.f32 %v4453_v5, %v5124_v29  ;;  %v4678_v5 = vld [vmem:[#allocation8 + $0x24] ss:$16 sps:$4 sm:$0xff]  }
 0x1dd   :  { %v2588_v61 = vrot.slane %v2587_v50, 1  ;;  %v2593_v62 = vadd.f32 %v2592_v54, %v2327_v52  ;;  %v2328_v0 = vmax.f32 %v1512_v55, 0.0  ;;  %v2464_v39 = vmax.f32 %v2056_v16, 0.0  ;;  %v4457_v54 = vpop.f32.mrb[30].mxu1  ;;  %3059 = vmatprep.subr.bf16.mxu1 %v4678_v5 }
 0x1de   :  { %v2748_v40 = vadd.f32 %v2747_v28, %v2462_v14  ;;  %v2465_v49 = vmax.f32 %v2061_v30, 0.0  ;;  %v2069_v52 = vadd.f32 %v5124_v29, %v2068_v48  ;;  %v2071_v59 = vpop.f32.mrb[31].mxu1  ;;  %3060 = vmatpush1.bf16.msra.mxu1 %v4676_v4  ;;  %v2080_v16 = vadd.f32 %v4457_v54, %v5124_v29 }
 0x1df   :  { %v2589_v7 = vadd.f32 %v2588_v61, %v2587_v50  ;;  %v2594_v9 = vadd.f32 %v2593_v62, %v2328_v0  ;;  %v4320_v10 = vpop.f32.mrb[72].mxu0  ;;  %v2466_v61 = vmax.f32 %v2064_v41, 0.0  ;;  %v2072_v63 = vadd.f32 %v5124_v29, %v2071_v59 }
 0x1e0   :  { %v1524_v12 = vpop.f32.mrb[73].mxu0  ;;  %v1533_v32 = vadd.f32 %v4320_v10, %v5124_v29  ;;  %v2749_v50 = vadd.f32 %v2748_v40, %v2463_v31  ;;  %v2470_v41 = vmax.f32 %v2080_v16, 0.0 }
 0x1e1   :  { %v5240_v19 = vsel %vm2820_vm0, %v2589_v7, %v2552_v6  ;;  %v2595_v22 = vadd.f32 %v2594_v9, %v2329_v8  ;;  %v1525_v23 = vadd.f32 %v5124_v29, %v1524_v12  ;;  %v4321_v24 = vpop.f32.mrb[74].mxu0  ;;  %v2077_v8 = vadd.f32 %v4456_v43, %v5124_v29  ;;  %v5260_v43 = vld [vmem:[%s5497_s2] ss:$0 sm:$0xff] }
 0x1e2   :  { %v1527_v18 = vpop.f32.mrb[75].mxu0  ;;  %v1536_v46 = vadd.f32 %v4321_v24, %v5124_v29  ;;  %v2333_v55 = vmax.f32 %v1533_v32, 0.0  ;;  %v2750_v62 = vadd.f32 %v2749_v50, %v2464_v39  ;;  %v2467_v9 = vmax.f32 %v2069_v52, 0.0 }
 0x1e3   :  { %v2331_v34 = vmax.f32 %v1525_v23, 0.0  ;;  %v2596_v35 = vadd.f32 %v2595_v22, %v2330_v21  ;;  %v1528_v36 = vadd.f32 %v5124_v29, %v1527_v18  ;;  %v2468_v21 = vmax.f32 %v2072_v63, 0.0  ;;  %v4460_v22 = vpop.f32.mrb[32].mxu1 }
 0x1e4   :  { %v2334_v0 = vmax.f32 %v1536_v46, 0.0  ;;  %v2751_v7 = vadd.f32 %v2750_v62, %v2465_v49  ;;  %v2084_v27 = vpop.f32.mrb[33].mxu1  ;;  %v2469_v18 = vmax.f32 %v2077_v8, 0.0  ;;  %v2093_v52 = vadd.f32 %v5260_v43, %v4460_v22 }
 0x1e5   :  { %v2597_v44 = vadd.f32 %v2596_v35, %v2331_v34  ;;  %v2332_v47 = vmax.f32 %v1528_v36, 0.0  ;;  %v2085_v30 = vadd.f32 %v5124_v29, %v2084_v27  ;;  %v4461_v31 = vpop.f32.mrb[34].mxu1  ;;  %v4681_v27 = vld [vmem:[#allocation8 + $0x44] ss:$16 sps:$4 sm:$0xff]  }
 0x1e6   :  { %v2752_v15 = vadd.f32 %v2751_v7, %v2466_v61  ;;  %v2087_v36 = vpop.f32.mrb[35].mxu1  ;;  %v2096_v61 = vadd.f32 %v5260_v43, %v4461_v31  ;;  %v2473_v4 = vmax.f32 %v2093_v52, 0.0  ;;  %3061 = vmatprep.subr.bf16.mxu1 %v4681_v27 }
 0x1e7   :  { %v2598_v56 = vadd.f32 %v2597_v44, %v2332_v47  ;;  %v4324_v57 = vpop.f32.mrb[76].mxu0  ;;  %v2088_v44 = vadd.f32 %v5260_v43, %v2087_v36  ;;  %v2471_v54 = vmax.f32 %v2085_v30, 0.0  ;;  %v4464_v63 = vpop.f32.mrb[36].mxu1 }
 0x1e8   :  { %v1540_v60 = vpop.f32.mrb[77].mxu0  ;;  %v1549_v10 = vadd.f32 %v4324_v57, %v5124_v29  ;;  %v2753_v28 = vadd.f32 %v2752_v15, %v2467_v9  ;;  %v2109_v30 = vadd.f32 %v5260_v43, %v4464_v63 }
 0x1e9   :  { %v2599_v1 = vadd.f32 %v2598_v56, %v2333_v55  ;;  %v1541_v2 = vadd.f32 %v5124_v29, %v1540_v60  ;;  %v4325_v3 = vpop.f32.mrb[78].mxu0  ;;  %v2472_v62 = vmax.f32 %v2088_v44, 0.0 }
 0x1ea   :  { %v1543_v6 = vpop.f32.mrb[79].mxu0  ;;  %v1552_v24 = vadd.f32 %v4325_v3, %v5124_v29  ;;  %v2337_v32 = vmax.f32 %v1549_v10, 0.0  ;;  %v2754_v39 = vadd.f32 %v2753_v28, %v2468_v21  ;;  %v2100_v3 = vpop.f32.mrb[37].mxu1 }
 0x1eb   :  { %v2335_v11 = vmax.f32 %v1541_v2, 0.0  ;;  %v2600_v12 = vadd.f32 %v2599_v1, %v2334_v0  ;;  %v1544_v14 = vadd.f32 %v5124_v29, %v1543_v6  ;;  %v2101_v6 = vadd.f32 %v5260_v43, %v2100_v3  ;;  %v4465_v7 = vpop.f32.mrb[38].mxu1 }
 0x1ec   :  { %v2338_v46 = vmax.f32 %v1552_v24, 0.0  ;;  %v2755_v50 = vadd.f32 %v2754_v39, %v2469_v18 }
 0x1ed   :  { %v2601_v23 = vadd.f32 %v2600_v12, %v2335_v11  ;;  %v2336_v25 = vmax.f32 %v1544_v14, 0.0  ;;  %v2103_v11 = vpop.f32.mrb[39].mxu1  ;;  %v2474_v14 = vmax.f32 %v2096_v61, 0.0  ;;  %v2475_v31 = vmax.f32 %v2101_v6, 0.0 }
 0x1ee   :  { %v2756_v60 = vadd.f32 %v2755_v50, %v2470_v41  ;;  %v2104_v16 = vadd.f32 %v5260_v43, %v2103_v11  ;;  %v2112_v41 = vadd.f32 %v5260_v43, %v4465_v7  ;;  %v4468_v44 = vpop.f32.mrb[40].mxu1 }
 0x1ef   :  { %v2602_v34 = vadd.f32 %v2601_v23, %v2336_v25  ;;  %v4328_v35 = vpop.f32.mrb[80].mxu0  ;;  %v4679_v25 = vld [vmem:[#allocation8 + $0x40] ss:$16 sps:$4 sm:$0xff]   ;;  %v2125_v6 = vadd.f32 %v5260_v43, %v4468_v44 }
 0x1f0   :  { %v1556_v40 = vpop.f32.mrb[81].mxu0  ;;  %v1565_v55 = vadd.f32 %v5260_v43, %v4328_v35  ;;  %v2757_v5 = vadd.f32 %v2756_v60, %v2471_v54  ;;  %3062 = vmatpush1.bf16.msra.mxu1 %v4679_v25  ;;  %v2476_v39 = vmax.f32 %v2104_v16, 0.0  ;;  %v2478_v61 = vmax.f32 %v2112_v41, 0.0 }
 0x1f1   :  { %v2603_v47 = vadd.f32 %v2602_v34, %v2337_v32  ;;  %v1557_v48 = vadd.f32 %v5260_v43, %v1556_v40  ;;  %v4329_v29 = vpop.f32.mrb[82].mxu0  ;;  %v2481_v25 = vmax.f32 %v2125_v6, 0.0 }
 0x1f2   :  { %v1559_v49 = vpop.f32.mrb[83].mxu0  ;;  %v1568_v1 = vadd.f32 %v5260_v43, %v4329_v29  ;;  %v2341_v8 = vmax.f32 %v1565_v55, 0.0  ;;  %v2758_v15 = vadd.f32 %v2757_v5, %v2472_v62  ;;  %v2116_v29 = vpop.f32.mrb[41].mxu1 }
 0x1f3   :  { %v2339_v56 = vmax.f32 %v1557_v48, 0.0  ;;  %v2604_v57 = vadd.f32 %v2603_v47, %v2338_v46  ;;  %v1560_v59 = vadd.f32 %v5260_v43, %v1559_v49  ;;  %v2477_v49 = vmax.f32 %v2109_v30, 0.0  ;;  %v4469_v54 = vpop.f32.mrb[42].mxu1 }
 0x1f4   :  { %v2342_v21 = vmax.f32 %v1568_v1, 0.0  ;;  %v2759_v28 = vadd.f32 %v2758_v15, %v2473_v4  ;;  %v2117_v52 = vadd.f32 %v5260_v43, %v2116_v29 }
 0x1f5   :  { %v2605_v0 = vadd.f32 %v2604_v57, %v2339_v56  ;;  %v2340_v2 = vmax.f32 %v1560_v59, 0.0  ;;  %v2119_v59 = vpop.f32.mrb[43].mxu1 }
 0x1f6   :  { %v2760_v40 = vadd.f32 %v2759_v28, %v2474_v14  ;;  %v2120_v63 = vadd.f32 %v5260_v43, %v2119_v59  ;;  %v2479_v7 = vmax.f32 %v2117_v52, 0.0  ;;  %v2128_v14 = vadd.f32 %v5260_v43, %v4469_v54  ;;  %v4472_v16 = vpop.f32.mrb[44].mxu1 }
 0x1f7   :  { %v2606_v9 = vadd.f32 %v2605_v0, %v2340_v2  ;;  %v4332_v10 = vpop.f32.mrb[84].mxu0 }
 0x1f8   :  { %v1572_v12 = vpop.f32.mrb[85].mxu0  ;;  %v1581_v32 = vadd.f32 %v5260_v43, %v4332_v10  ;;  %v2761_v50 = vadd.f32 %v2760_v40, %v2475_v31  ;;  %v2480_v15 = vmax.f32 %v2120_v63, 0.0 }
 0x1f9   :  { %v2607_v22 = vadd.f32 %v2606_v9, %v2341_v8  ;;  %v1573_v23 = vadd.f32 %v5260_v43, %v1572_v12  ;;  %v4333_v24 = vpop.f32.mrb[86].mxu0 }
 0x1fa   :  { %v1575_v18 = vpop.f32.mrb[87].mxu0  ;;  %v1584_v47 = vadd.f32 %v5260_v43, %v4333_v24  ;;  %v2345_v55 = vmax.f32 %v1581_v32, 0.0  ;;  %v2762_v62 = vadd.f32 %v2761_v50, %v2476_v39  ;;  %v2132_v24 = vpop.f32.mrb[45].mxu1 }
 0x1fb   :  { %v2343_v34 = vmax.f32 %v1573_v23, 0.0  ;;  %v2608_v35 = vadd.f32 %v2607_v22, %v2342_v21  ;;  %v1576_v36 = vadd.f32 %v5260_v43, %v1575_v18  ;;  %v4473_v18 = vpop.f32.mrb[46].mxu1  ;;  %v2133_v40 = vadd.f32 %v5260_v43, %v2132_v24 }
 0x1fc   :  { %v2346_v0 = vmax.f32 %v1584_v47, 0.0  ;;  %v2763_v5 = vadd.f32 %v2762_v62, %v2477_v49  ;;  %v2135_v32 = vpop.f32.mrb[47].mxu1 }
 0x1fd   :  { %v2609_v46 = vadd.f32 %v2608_v35, %v2343_v34  ;;  %v2344_v48 = vmax.f32 %v1576_v36, 0.0  ;;  %v2482_v35 = vmax.f32 %v2128_v14, 0.0  ;;  %v2136_v41 = vadd.f32 %v5260_v43, %v2135_v32  ;;  %v4476_v63 = vpop.f32.mrb[48].mxu1 }
 0x1fe   :  { %v2764_v12 = vadd.f32 %v2763_v5, %v2478_v61  ;;  %v2483_v52 = vmax.f32 %v2133_v40, 0.0 }
 0x1ff   :  { %v2610_v56 = vadd.f32 %v2609_v46, %v2344_v48  ;;  %v4336_v57 = vpop.f32.mrb[88].mxu0  ;;  %v2141_v48 = vadd.f32 %v5260_v43, %v4472_v16  ;;  %v2484_v62 = vmax.f32 %v2136_v41, 0.0 }
 0x200   :  { %v1588_v60 = vpop.f32.mrb[89].mxu0  ;;  %v1597_v8 = vadd.f32 %v5260_v43, %v4336_v57  ;;  %v2765_v27 = vadd.f32 %v2764_v12, %v2479_v7  ;;  %v2144_v57 = vadd.f32 %v5260_v43, %v4473_v18  ;;  %v2157_v18 = vadd.f32 %v5260_v43, %v4476_v63 }
 0x201   :  { %v2611_v1 = vadd.f32 %v2610_v56, %v2345_v55  ;;  %v1589_v2 = vadd.f32 %v5260_v43, %v1588_v60  ;;  %v4337_v3 = vpop.f32.mrb[90].mxu0  ;;  %v2485_v61 = vmax.f32 %v2141_v48, 0.0  ;;  %v2775_v5 = vadd.f32 %v2484_v62, %v2483_v52 }
 0x202   :  { %v1591_v4 = vpop.f32.mrb[91].mxu0  ;;  %v1600_v22 = vadd.f32 %v5260_v43, %v4337_v3  ;;  %v2349_v28 = vmax.f32 %v1597_v8, 0.0  ;;  %v2766_v36 = vadd.f32 %v2765_v27, %v2480_v15  ;;  %v4684_v3 = vld [vmem:[#allocation8 + $0x64] ss:$16 sps:$4 sm:$0xff]  }
 0x203   :  { %v2347_v9 = vmax.f32 %v1589_v2, 0.0  ;;  %v2612_v10 = vadd.f32 %v2611_v1, %v2346_v0  ;;  %v1592_v11 = vadd.f32 %v5260_v43, %v1591_v4  ;;  %v4682_v2 = vld [vmem:[#allocation8 + $0x60] ss:$16 sps:$4 sm:$0xff]   ;;  %v2148_v4 = vpop.f32.mrb[49].mxu1  ;;  %3063 = vmatprep.subr.bf16.mxu1 %v4684_v3  ;;  %v2776_v16 = vadd.f32 %v2775_v5, %v2485_v61 }
 0x204   :  { %v2350_v39 = vmax.f32 %v1600_v22, 0.0  ;;  %v2767_v50 = vadd.f32 %v2766_v36, %v2481_v25  ;;  %v2149_v6 = vadd.f32 %v5260_v43, %v2148_v4  ;;  %v4477_v7 = vpop.f32.mrb[50].mxu1  ;;  %3064 = vmatpush1.bf16.msra.mxu1 %v4682_v2  ;;  %v2489_v36 = vmax.f32 %v2157_v18, 0.0 }
 0x205   :  { %v2613_v21 = vadd.f32 %v2612_v10, %v2347_v9  ;;  %v2348_v23 = vmax.f32 %v1592_v11, 0.0  ;;  %v2486_v11 = vmax.f32 %v2144_v57, 0.0  ;;  %v2151_v12 = vpop.f32.mrb[51].mxu1  ;;  %v2160_v40 = vadd.f32 %v5260_v43, %v4477_v7 }
 0x206   :  { %v5293_v60 = vadd.f32 %v2767_v50, %v2482_v35  ;;  %v2487_v24 = vmax.f32 %v2149_v6, 0.0  ;;  %v2152_v25 = vadd.f32 %v5260_v43, %v2151_v12  ;;  %v4480_v41 = vpop.f32.mrb[52].mxu1 }
 0x207   :  { %v2614_v30 = vadd.f32 %v2613_v21, %v2348_v23  ;;  %v4340_v31 = vpop.f32.mrb[92].mxu0  ;;  %v2777_v32 = vadd.f32 %v2776_v16, %v2486_v11  ;;  %v2164_v48 = vpop.f32.mrb[53].mxu1  ;;  %v2490_v62 = vmax.f32 %v2160_v40, 0.0  ;;  %v2173_v7 = vadd.f32 %v5260_v43, %v4480_v41 }
 0x208   :  { %v1604_v34 = vpop.f32.mrb[93].mxu0  ;;  %v1613_v29 = vadd.f32 %v5260_v43, %v4340_v31 }
 0x209   :  { %v2615_v44 = vadd.f32 %v2614_v30, %v2349_v28  ;;  %v1605_v46 = vadd.f32 %v5260_v43, %v1604_v34  ;;  %v4341_v47 = vpop.f32.mrb[94].mxu0  ;;  %v2493_v18 = vmax.f32 %v2173_v7, 0.0 }
 0x20a   :  { %v1607_v49 = vpop.f32.mrb[95].mxu0  ;;  %v1616_v59 = vadd.f32 %v5260_v43, %v4341_v47  ;;  %v2353_v8 = vmax.f32 %v1613_v29, 0.0  ;;  %v2488_v47 = vmax.f32 %v2152_v25, 0.0  ;;  %v2165_v29 = vadd.f32 %v5260_v43, %v2164_v48 }
 0x20b   :  { %v2351_v54 = vmax.f32 %v1605_v46, 0.0  ;;  %v2616_v55 = vadd.f32 %v2615_v44, %v2350_v39  ;;  %v1608_v56 = vadd.f32 %v5260_v43, %v1607_v49  ;;  %v2778_v46 = vadd.f32 %v2777_v32, %v2487_v24  ;;  %v4481_v49 = vpop.f32.mrb[54].mxu1 }
 0x20c   :  { %v2354_v14 = vmax.f32 %v1616_v59, 0.0  ;;  %v2167_v57 = vpop.f32.mrb[55].mxu1 }
 0x20d   :  { %v2617_v0 = vadd.f32 %v2616_v55, %v2351_v54  ;;  %v2352_v1 = vmax.f32 %v1608_v56, 0.0  ;;  %v2779_v56 = vadd.f32 %v2778_v46, %v2488_v47  ;;  %v2168_v63 = vadd.f32 %v5260_v43, %v2167_v57 }
 0x20f   :  { %v2618_v9 = vadd.f32 %v2617_v0, %v2352_v1  ;;  %v4344_v10 = vpop.f32.mrb[96].mxu0  ;;  %v2780_v4 = vadd.f32 %v2779_v56, %v2489_v36  ;;  %v2492_v16 = vmax.f32 %v2168_v63, 0.0 }
 0x210   :  { %v1620_v15 = vpop.f32.mrb[97].mxu0  ;;  %v1629_v30 = vadd.f32 %v5260_v43, %v4344_v10 }
 0x211   :  { %v2619_v21 = vadd.f32 %v2618_v9, %v2353_v8  ;;  %v1621_v22 = vadd.f32 %v5260_v43, %v1620_v15  ;;  %v4345_v23 = vpop.f32.mrb[98].mxu0  ;;  %v2491_v8 = vmax.f32 %v2165_v29, 0.0  ;;  %v2176_v15 = vadd.f32 %v5260_v43, %v4481_v49 }
 0x212   :  { %v1623_v27 = vpop.f32.mrb[99].mxu0  ;;  %v1632_v35 = vadd.f32 %v5260_v43, %v4345_v23  ;;  %v2357_v52 = vmax.f32 %v1629_v30, 0.0 }
 0x213   :  { %v2620_v28 = vadd.f32 %v2619_v21, %v2354_v14  ;;  %v1624_v31 = vadd.f32 %v5260_v43, %v1623_v27  ;;  %v2355_v34 = vmax.f32 %v1621_v22, 0.0  ;;  %v2781_v14 = vadd.f32 %v2780_v4, %v2490_v62  ;;  %v4484_v21 = vpop.f32.mrb[56].mxu1 }
 0x214   :  { %v2358_v59 = vmax.f32 %v1632_v35, 0.0  ;;  %v2180_v27 = vpop.f32.mrb[57].mxu1  ;;  %v2189_v57 = vadd.f32 %v5260_v43, %v4484_v21 }
 0x215   :  { %v2621_v39 = vrot.slane %v2620_v28, 4  ;;  %v2356_v44 = vmax.f32 %v1624_v31, 0.0  ;;  %v2181_v30 = vadd.f32 %v5260_v43, %v2180_v27  ;;  %v4485_v31 = vpop.f32.mrb[58].mxu1 }
 0x216   :  { %v2183_v40 = vpop.f32.mrb[59].mxu1 }
 0x217   :  { %v2622_v50 = vadd.f32 %v2621_v39, %v2620_v28  ;;  %v2627_v54 = vadd.f32 %v2356_v44, %v2355_v34  ;;  %v4348_v55 = vpop.f32.mrb[100].mxu0  ;;  %v2782_v28 = vadd.f32 %v2781_v14, %v2491_v8  ;;  %v2494_v39 = vmax.f32 %v2176_v15, 0.0 }
 0x218   :  { %v1636_v61 = vpop.f32.mrb[101].mxu0  ;;  %v1645_v5 = vadd.f32 %v5260_v43, %v4348_v55  ;;  %v2184_v46 = vadd.f32 %v5260_v43, %v2183_v40  ;;  %v2497_v8 = vmax.f32 %v2189_v57, 0.0 }
 0x219   :  { %v2623_v0 = vrot.slane %v2622_v50, 2  ;;  %v2628_v1 = vadd.f32 %v2627_v54, %v2357_v52  ;;  %v1637_v2 = vadd.f32 %v5260_v43, %v1636_v61  ;;  %v4349_v3 = vpop.f32.mrb[102].mxu0  ;;  %v2783_v44 = vadd.f32 %v2782_v28, %v2492_v16  ;;  %v4685_v52 = vld [vmem:[#allocation8 + $0x80] ss:$16 sps:$4 sm:$0xff]   ;;  %v4687_v54 = vld [vmem:[#allocation8 + $0x84] ss:$16 sps:$4 sm:$0xff]  }
 0x21a   :  { %v1639_v6 = vpop.f32.mrb[103].mxu0  ;;  %v1648_v24 = vadd.f32 %v5260_v43, %v4349_v3  ;;  %v2361_v34 = vmax.f32 %v1645_v5, 0.0  ;;  %3065 = vmatprep.subr.bf16.mxu1 %v4687_v54  ;;  %v4488_v3 = vpop.f32.mrb[60].mxu1 }
 0x21b   :  { %v2624_v9 = vadd.f32 %v2623_v0, %v2622_v50  ;;  %v2359_v10 = vmax.f32 %v1637_v2, 0.0  ;;  %v2629_v11 = vadd.f32 %v2628_v1, %v2358_v59  ;;  %v1640_v12 = vadd.f32 %v5260_v43, %v1639_v6  ;;  %3066 = vmatpush1.bf16.msra.mxu1 %v4685_v52  ;;  %v2196_v7 = vpop.f32.mrb[61].mxu1 }
 0x21c   :  { %v2362_v48 = vmax.f32 %v1648_v24, 0.0  ;;  %v2784_v56 = vadd.f32 %v2783_v44, %v2493_v18  ;;  %v2495_v59 = vmax.f32 %v2181_v30, 0.0  ;;  %v2192_v1 = vadd.f32 %v5260_v43, %v4485_v31 }
 0x21d   :  { %v2625_v22 = vrot.slane %v2624_v9, 1  ;;  %v2630_v23 = vadd.f32 %v2629_v11, %v2359_v10  ;;  %v2360_v25 = vmax.f32 %v1640_v12, 0.0  ;;  %v2496_v2 = vmax.f32 %v2184_v46, 0.0  ;;  %v4489_v11 = vpop.f32.mrb[62].mxu1 }
 0x21e   :  { %v2197_v10 = vadd.f32 %v5260_v43, %v2196_v7  ;;  %v2199_v16 = vpop.f32.mrb[63].mxu1  ;;  %v2208_v44 = vadd.f32 %v5260_v43, %v4489_v11  ;;  %v4688_v7 = vld [vmem:[#allocation8 + $0xa0] ss:$16 sps:$4 sm:$0xff]  }
 0x21f   :  { %v2626_v32 = vadd.f32 %v2625_v22, %v2624_v9  ;;  %v2631_v35 = vadd.f32 %v2630_v23, %v2360_v25  ;;  %v4352_v36 = vpop.f32.mrb[104].mxu0  ;;  %v2498_v22 = vmax.f32 %v2192_v1, 0.0  ;;  %v2200_v24 = vadd.f32 %v5260_v43, %v2199_v16 }
 0x220   :  { %v1652_v41 = vpop.f32.mrb[105].mxu0  ;;  %v1661_v61 = vadd.f32 %v5260_v43, %v4352_v36 }
 0x221   :  { %v5314_v47 = vsel %vm2822_vm1, %v2626_v32, %v5240_v19  ;;  %v2632_v29 = vadd.f32 %v2631_v35, %v2361_v34  ;;  %v1653_v49 = vadd.f32 %v5260_v43, %v1652_v41  ;;  %v4353_v50 = vpop.f32.mrb[106].mxu0  ;;  %v2785_v19 = vadd.f32 %v2784_v56, %v2494_v39 }
 0x222   :  { %v1655_v55 = vpop.f32.mrb[107].mxu0  ;;  %v1664_v5 = vadd.f32 %v5260_v43, %v4353_v50  ;;  %v2365_v12 = vmax.f32 %v1661_v61, 0.0  ;;  %v2205_v32 = vadd.f32 %v5260_v43, %v4488_v3  ;;  %v2499_v34 = vmax.f32 %v2197_v10, 0.0 }
 0x223   :  { %v2363_v62 = vmax.f32 %v1653_v49, 0.0  ;;  %v2633_v63 = vadd.f32 %v2632_v29, %v2362_v48  ;;  %v1656_v0 = vadd.f32 %v5260_v43, %v1655_v55  ;;  %v2786_v9 = vadd.f32 %v2785_v19, %v2495_v59  ;;  %v4492_v48 = vpop.f32.mrb[64].mxu1 }
 0x224   :  { %v2366_v25 = vmax.f32 %v1664_v5, 0.0  ;;  %v2500_v46 = vmax.f32 %v2200_v24, 0.0  ;;  %v2212_v52 = vpop.f32.mrb[65].mxu1  ;;  %v2501_v54 = vmax.f32 %v2205_v32, 0.0  ;;  %v2502_v19 = vmax.f32 %v2208_v44, 0.0 }
 0x225   :  { %v2634_v4 = vadd.f32 %v2633_v63, %v2363_v62  ;;  %v2364_v6 = vmax.f32 %v1656_v0, 0.0  ;;  %v2787_v23 = vadd.f32 %v2786_v9, %v2496_v2  ;;  %v2213_v56 = vadd.f32 %v5260_v43, %v2212_v52  ;;  %v4493_v57 = vpop.f32.mrb[66].mxu1 }
 0x226   :  { %v2215_v63 = vpop.f32.mrb[67].mxu1  ;;  %v2221_v11 = vadd.f32 %v5260_v43, %v4492_v48 }
 0x227   :  { %v2635_v14 = vadd.f32 %v2634_v4, %v2364_v6  ;;  %v4356_v15 = vpop.f32.mrb[108].mxu0  ;;  %v2788_v31 = vadd.f32 %v2787_v23, %v2497_v8  ;;  %v2216_v2 = vadd.f32 %v5260_v43, %v2215_v63  ;;  %v4690_v8 = vld [vmem:[#allocation8 + $0xa4] ss:$16 sps:$4 sm:$0xff]   ;;  %v2224_v23 = vadd.f32 %v5260_v43, %v4493_v57 }
 0x228   :  { %v1668_v21 = vpop.f32.mrb[109].mxu0  ;;  %v1677_v35 = vadd.f32 %v5260_v43, %v4356_v15  ;;  %3067 = vmatprep.subr.bf16.mxu1 %v4690_v8 }
 0x229   :  { %v2636_v27 = vadd.f32 %v2635_v14, %v2365_v12  ;;  %v1669_v18 = vadd.f32 %v5260_v43, %v1668_v21  ;;  %v4357_v28 = vpop.f32.mrb[110].mxu0  ;;  %v2789_v39 = vadd.f32 %v2788_v31, %v2498_v22  ;;  %v2503_v12 = vmax.f32 %v2213_v56, 0.0  ;;  %3068 = vmatpush1.bf16.msra.mxu1 %v4688_v7 }
 0x22a   :  { %v1671_v30 = vpop.f32.mrb[111].mxu0  ;;  %v1680_v49 = vadd.f32 %v5260_v43, %v4357_v28  ;;  %v2369_v59 = vmax.f32 %v1677_v35, 0.0  ;;  %v2504_v24 = vmax.f32 %v2216_v2, 0.0  ;;  %v2505_v31 = vmax.f32 %v2221_v11, 0.0 }
 0x22b   :  { %v2367_v36 = vmax.f32 %v1669_v18, 0.0  ;;  %v2637_v40 = vadd.f32 %v2636_v27, %v2366_v25  ;;  %v1672_v41 = vadd.f32 %v5260_v43, %v1671_v30  ;;  %v2790_v55 = vadd.f32 %v2789_v39, %v2499_v34  ;;  %v4496_v25 = vpop.f32.mrb[68].mxu1 }
 0x22c   :  { %v2370_v3 = vmax.f32 %v1680_v49, 0.0  ;;  %v2228_v30 = vpop.f32.mrb[69].mxu1  ;;  %v2237_v57 = vadd.f32 %v5260_v43, %v4496_v25 }
 0x22d   :  { %v2638_v29 = vadd.f32 %v2637_v40, %v2367_v36  ;;  %v2368_v50 = vmax.f32 %v1672_v41, 0.0  ;;  %v2791_v1 = vadd.f32 %v2790_v55, %v2500_v46  ;;  %v2229_v34 = vadd.f32 %v5260_v43, %v2228_v30  ;;  %v4497_v35 = vpop.f32.mrb[70].mxu1 }
 0x22e   :  { %v2231_v39 = vpop.f32.mrb[71].mxu1  ;;  %v2506_v46 = vmax.f32 %v2224_v23, 0.0  ;;  %v2509_v8 = vmax.f32 %v2237_v57, 0.0 }
 0x22f   :  { %v2639_v61 = vadd.f32 %v2638_v29, %v2368_v50  ;;  %v4360_v62 = vpop.f32.mrb[112].mxu0  ;;  %v2792_v10 = vadd.f32 %v2791_v1, %v2501_v54  ;;  %v2232_v29 = vadd.f32 %v5260_v43, %v2231_v39  ;;  %v2240_v1 = vadd.f32 %v5260_v43, %v4497_v35 }
 0x230   :  { %v1684_v0 = vpop.f32.mrb[113].mxu0  ;;  %v1693_v14 = vadd.f32 %v5260_v43, %v4360_v62 }
 0x231   :  { %v2640_v4 = vadd.f32 %v2639_v61, %v2369_v59  ;;  %v1685_v5 = vadd.f32 %v5260_v43, %v1684_v0  ;;  %v4361_v6 = vpop.f32.mrb[114].mxu0  ;;  %v2793_v22 = vadd.f32 %v2792_v10, %v2502_v19  ;;  %v2507_v59 = vmax.f32 %v2229_v34, 0.0 }
 0x232   :  { %v1687_v9 = vpop.f32.mrb[115].mxu0  ;;  %v1696_v18 = vadd.f32 %v5260_v43, %v4361_v6  ;;  %v2373_v36 = vmax.f32 %v1693_v14, 0.0  ;;  %v2508_v2 = vmax.f32 %v2232_v29, 0.0 }
 0x233   :  { %v2371_v15 = vmax.f32 %v1685_v5, 0.0  ;;  %v2641_v16 = vadd.f32 %v2640_v4, %v2370_v3  ;;  %v1688_v21 = vadd.f32 %v5260_v43, %v1687_v9  ;;  %v2794_v32 = vadd.f32 %v2793_v22, %v2503_v12  ;;  %v4500_v3 = vpop.f32.mrb[72].mxu1 }
 0x234   :  { %v2374_v49 = vmax.f32 %v1696_v18, 0.0  ;;  %v2244_v7 = vpop.f32.mrb[73].mxu1  ;;  %v2510_v22 = vmax.f32 %v2240_v1, 0.0 }
 0x235   :  { %v2642_v27 = vadd.f32 %v2641_v16, %v2371_v15  ;;  %v2372_v28 = vmax.f32 %v1688_v21, 0.0  ;;  %v2795_v48 = vadd.f32 %v2794_v32, %v2504_v24  ;;  %v2245_v10 = vadd.f32 %v5260_v43, %v2244_v7  ;;  %v4501_v11 = vpop.f32.mrb[74].mxu1 }
 0x236   :  { %v2247_v16 = vpop.f32.mrb[75].mxu1  ;;  %v2253_v32 = vadd.f32 %v5260_v43, %v4500_v3 }
 0x237   :  { %v2643_v40 = vadd.f32 %v2642_v27, %v2372_v28  ;;  %v4364_v41 = vpop.f32.mrb[116].mxu0  ;;  %v2796_v56 = vadd.f32 %v2795_v48, %v2505_v31  ;;  %v2248_v24 = vadd.f32 %v5260_v43, %v2247_v16  ;;  %v2511_v34 = vmax.f32 %v2245_v10, 0.0 }
 0x238   :  { %v1700_v44 = vpop.f32.mrb[117].mxu0  ;;  %v1709_v61 = vadd.f32 %v5260_v43, %v4364_v41 }
 0x239   :  { %v2644_v50 = vadd.f32 %v2643_v40, %v2373_v36  ;;  %v1701_v52 = vadd.f32 %v5260_v43, %v1700_v44  ;;  %v4365_v54 = vpop.f32.mrb[118].mxu0  ;;  %v2797_v19 = vadd.f32 %v2796_v56, %v2506_v46  ;;  %v2256_v44 = vadd.f32 %v5260_v43, %v4501_v11 }
 0x23a   :  { %v1703_v55 = vpop.f32.mrb[119].mxu0  ;;  %v1712_v5 = vadd.f32 %v5260_v43, %v4365_v54  ;;  %v2377_v12 = vmax.f32 %v1709_v61, 0.0  ;;  %v2512_v46 = vmax.f32 %v2248_v24, 0.0  ;;  %v4691_v24 = vld [vmem:[#allocation8 + $0xc0] ss:$16 sps:$4 sm:$0xff]  }
 0x23b   :  { %v2375_v62 = vmax.f32 %v1701_v52, 0.0  ;;  %v2645_v63 = vadd.f32 %v2644_v50, %v2374_v49  ;;  %v1704_v0 = vadd.f32 %v5260_v43, %v1703_v55  ;;  %v2798_v9 = vadd.f32 %v2797_v19, %v2507_v59 }
 0x23c   :  { %v2378_v25 = vmax.f32 %v1712_v5, 0.0  ;;  %v2513_v50 = vmax.f32 %v2253_v32, 0.0  ;;  %v2514_v59 = vmax.f32 %v2256_v44, 0.0  ;;  %v4696_v32 = vld [vmem:[#allocation8 + $0xe4] ss:$16 sps:$4 sm:$0xff]  }
 0x23d   :  { %v2646_v4 = vadd.f32 %v2645_v63, %v2375_v62  ;;  %v2376_v6 = vmax.f32 %v1704_v0, 0.0  ;;  %v2799_v23 = vadd.f32 %v2798_v9, %v2508_v2 }
 0x23f   :  { %v2647_v14 = vadd.f32 %v2646_v4, %v2376_v6  ;;  %v4368_v15 = vpop.f32.mrb[120].mxu0  ;;  %v2800_v31 = vadd.f32 %v2799_v23, %v2509_v8 }
 0x240   :  { %v1716_v21 = vpop.f32.mrb[121].mxu0  ;;  %v1725_v35 = vadd.f32 %v5260_v43, %v4368_v15 }
 0x241   :  { %v2648_v27 = vadd.f32 %v2647_v14, %v2377_v12  ;;  %v1717_v18 = vadd.f32 %v5260_v43, %v1716_v21  ;;  %v4369_v28 = vpop.f32.mrb[122].mxu0  ;;  %v2801_v39 = vadd.f32 %v2800_v31, %v2510_v22 }
 0x242   :  { %v1719_v30 = vpop.f32.mrb[123].mxu0  ;;  %v1728_v29 = vadd.f32 %v5260_v43, %v4369_v28  ;;  %v2381_v54 = vmax.f32 %v1725_v35, 0.0 }
 0x243   :  { %v2379_v36 = vmax.f32 %v1717_v18, 0.0  ;;  %v2649_v40 = vadd.f32 %v2648_v27, %v2378_v25  ;;  %v1720_v41 = vadd.f32 %v5260_v43, %v1719_v30  ;;  %v2802_v52 = vadd.f32 %v2801_v39, %v2511_v34  ;;  %v4693_v25 = vld [vmem:[#allocation8 + $0xc4] ss:$16 sps:$4 sm:$0xff]   ;;  %v4694_v34 = vld [vmem:[#allocation8 + $0xe0] ss:$16 sps:$4 sm:$0xff]  }
 0x244   :  { %v2382_v62 = vmax.f32 %v1728_v29, 0.0  ;;  %v4986_v18 = vmov 0   ;;  %3069 = vmatprep.subr.bf16.mxu1 %v4693_v25  ;;  %v4699_v39 = vld [vmem:[#allocation8 + $0xc] ss:$16 sps:$4 sm:$0xff]  }
 0x245   :  { %v2650_v48 = vadd.f32 %v2649_v40, %v2379_v36  ;;  %v2380_v49 = vmax.f32 %v1720_v41, 0.0  ;;  %v2803_v61 = vadd.f32 %v2802_v52, %v2512_v46  ;;  %3089 = vmatprep.mubr.bf16.mxu1 %v4986_v18  ;;  %3070 = vmatpush1.bf16.msra.mxu1 %v4691_v24 }
 0x246   :  { %3071 = vmatprep.subr.bf16.mxu1 %v4696_v32 }
 0x247   :  { %v2651_v55 = vadd.f32 %v2650_v48, %v2380_v49  ;;  %v4372_v56 = vpop.f32.mrb[124].mxu0  ;;  %v2804_v2 = vadd.f32 %v2803_v61, %v2513_v50 }
 0x248   :  { %v1732_v57 = vpop.f32.mrb[125].mxu0  ;;  %v1741_v3 = vadd.f32 %v5260_v43, %v4372_v56 }
 0x249   :  { %v2652_v63 = vadd.f32 %v2651_v55, %v2381_v54  ;;  %v1733_v0 = vadd.f32 %v5260_v43, %v1732_v57  ;;  %v4373_v19 = vpop.f32.mrb[126].mxu0  ;;  %v5358_v8 = vadd.f32 %v2804_v2, %v2514_v59  ;;  %3072 = vmatpush1.bf16.msra.mxu1 %v4694_v34 }
 0x24a   :  { %v1735_v1 = vpop.f32.mrb[127].mxu0  ;;  %v1744_v7 = vadd.f32 %v5260_v43, %v4373_v19  ;;  %v2385_v11 = vmax.f32 %v1741_v3, 0.0  ;;  %3098 = vmatprep.subr.bf16.mxu1 %v4699_v39 }
 0x24b   :  { %v2383_v4 = vmax.f32 %v1733_v0, 0.0  ;;  %v2653_v5 = vadd.f32 %v2652_v63, %v2382_v62  ;;  %v1736_v6 = vadd.f32 %v5260_v43, %v1735_v1 }
 0x24c   :  { %v2386_v15 = vmax.f32 %v1744_v7, 0.0 }
 0x24d   :  { %v2654_v9 = vadd.f32 %v2653_v5, %v2383_v4  ;;  %v2384_v10 = vmax.f32 %v1736_v6, 0.0 }
 0x24f   :  { %v2655_v12 = vadd.f32 %v2654_v9, %v2384_v10  ;;  %v4376_v14 = vpop.f32.mrb[128].mxu0 }
 0x250   :  { %v1748_v16 = vpop.f32.mrb[129].mxu0  ;;  %v1757_v30 = vadd.f32 %v5260_v43, %v4376_v14 }
 0x251   :  { %v2656_v21 = vadd.f32 %v2655_v12, %v2385_v11  ;;  %v1749_v22 = vadd.f32 %v5260_v43, %v1748_v16  ;;  %v4377_v23 = vpop.f32.mrb[130].mxu0 }
 0x252   :  { %v1751_v27 = vpop.f32.mrb[131].mxu0  ;;  %v1760_v40 = vadd.f32 %v5260_v43, %v4377_v23  ;;  %v2389_v46 = vmax.f32 %v1757_v30, 0.0 }
 0x253   :  { %v2657_v28 = vadd.f32 %v2656_v21, %v2386_v15  ;;  %v1752_v31 = vadd.f32 %v5260_v43, %v1751_v27  ;;  %v2387_v36 = vmax.f32 %v1749_v22, 0.0 }
 0x254   :  { %v2390_v52 = vmax.f32 %v1760_v40, 0.0 }
 0x255   :  { %v2658_v35 = vrot.slane %v2657_v28, 4  ;;  %v2388_v41 = vmax.f32 %v1752_v31, 0.0 }
 0x257   :  { %v2659_v44 = vadd.f32 %v2658_v35, %v2657_v28  ;;  %v2664_v48 = vadd.f32 %v2388_v41, %v2387_v36  ;;  %v4380_v29 = vpop.f32.mrb[132].mxu0 }
 0x258   :  { %v1764_v49 = vpop.f32.mrb[133].mxu0  ;;  %v1773_v57 = vadd.f32 %v5260_v43, %v4380_v29 }
 0x259   :  { %v2660_v50 = vrot.slane %v2659_v44, 2  ;;  %v2665_v54 = vadd.f32 %v2664_v48, %v2389_v46  ;;  %v1765_v55 = vadd.f32 %v5260_v43, %v1764_v49  ;;  %v4381_v56 = vpop.f32.mrb[134].mxu0 }
 0x25a   :  { %v1767_v59 = vpop.f32.mrb[135].mxu0  ;;  %v1776_v2 = vadd.f32 %v5260_v43, %v4381_v56  ;;  %v2393_v5 = vmax.f32 %v1773_v57, 0.0 }
 0x25b   :  { %v2661_v61 = vadd.f32 %v2660_v50, %v2659_v44  ;;  %v2391_v62 = vmax.f32 %v1765_v55, 0.0  ;;  %v2666_v63 = vadd.f32 %v2665_v54, %v2390_v52  ;;  %v1768_v0 = vadd.f32 %v5260_v43, %v1767_v59 }
 0x25c   :  { %v2394_v11 = vmax.f32 %v1776_v2, 0.0 }
 0x25d   :  { %v2662_v19 = vrot.slane %v2661_v61, 1  ;;  %v2667_v1 = vadd.f32 %v2666_v63, %v2391_v62  ;;  %v2392_v3 = vmax.f32 %v1768_v0, 0.0 }
 0x25f   :  { %v2663_v4 = vadd.f32 %v2662_v19, %v2661_v61  ;;  %v2668_v6 = vadd.f32 %v2667_v1, %v2392_v3  ;;  %v4384_v7 = vpop.f32.mrb[136].mxu0 }
 0x260   :  { %v1780_v9 = vpop.f32.mrb[137].mxu0  ;;  %v1789_v21 = vadd.f32 %v5260_v43, %v4384_v7 }
 0x261   :  { %v5370_v10 = vsel %vm2824_vm2, %v2663_v4, %v5314_v47  ;;  %v2669_v12 = vadd.f32 %v2668_v6, %v2393_v5  ;;  %v1781_v14 = vadd.f32 %v5260_v43, %v1780_v9  ;;  %v4385_v15 = vpop.f32.mrb[138].mxu0 }
 0x262   :  { %v1783_v16 = vpop.f32.mrb[139].mxu0  ;;  %v1792_v27 = vadd.f32 %v5260_v43, %v4385_v15  ;;  %v2397_v30 = vmax.f32 %v1789_v21, 0.0 }
 0x263   :  { %v2395_v22 = vmax.f32 %v1781_v14, 0.0  ;;  %v2670_v23 = vadd.f32 %v2669_v12, %v2394_v11  ;;  %v1784_v24 = vadd.f32 %v5260_v43, %v1783_v16 }
 0x264   :  { %v2398_v34 = vmax.f32 %v1792_v27, 0.0 }
 0x265   :  { %v2671_v25 = vadd.f32 %v2670_v23, %v2395_v22  ;;  %v2396_v28 = vmax.f32 %v1784_v24, 0.0 }
 0x267   :  { %v2672_v31 = vadd.f32 %v2671_v25, %v2396_v28  ;;  %v4388_v47 = vpop.f32.mrb[140].mxu0 }
 0x268   :  { %v1796_v32 = vpop.f32.mrb[141].mxu0  ;;  %v1805_v39 = vadd.f32 %v5260_v43, %v4388_v47 }
 0x269   :  { %v2673_v35 = vadd.f32 %v2672_v31, %v2397_v30  ;;  %v1797_v36 = vadd.f32 %v5260_v43, %v1796_v32  ;;  %v4389_v40 = vpop.f32.mrb[142].mxu0 }
 0x26a   :  { %v1799_v41 = vpop.f32.mrb[143].mxu0  ;;  %v1808_v49 = vadd.f32 %v5260_v43, %v4389_v40  ;;  %v2401_v52 = vmax.f32 %v1805_v39, 0.0 }
 0x26b   :  { %v2399_v44 = vmax.f32 %v1797_v36, 0.0  ;;  %v2674_v46 = vadd.f32 %v2673_v35, %v2398_v34  ;;  %v1800_v48 = vadd.f32 %v5260_v43, %v1799_v41 }
 0x26c   :  { %v2402_v57 = vmax.f32 %v1808_v49, 0.0 }
 0x26d   :  { %v2675_v29 = vadd.f32 %v2674_v46, %v2399_v44  ;;  %v2400_v50 = vmax.f32 %v1800_v48, 0.0 }
 0x26f   :  { %v2676_v54 = vadd.f32 %v2675_v29, %v2400_v50  ;;  %v4392_v55 = vpop.f32.mrb[144].mxu0  ;;  %v5394_v50 = vld [vmem:[%s5497_s2] ss:$0 sm:$0xff] }
 0x270   :  { %v1812_v56 = vpop.f32.mrb[145].mxu0  ;;  %v1821_v0 = vadd.f32 %v5260_v43, %v4392_v55 }
 0x271   :  { %v2677_v59 = vadd.f32 %v2676_v54, %v2401_v52  ;;  %v1813_v61 = vadd.f32 %v5260_v43, %v1812_v56  ;;  %v4393_v62 = vpop.f32.mrb[146].mxu0 }
 0x272   :  { %v1815_v63 = vpop.f32.mrb[147].mxu0  ;;  %v1824_v4 = vadd.f32 %v5260_v43, %v4393_v62  ;;  %v2405_v6 = vmax.f32 %v1821_v0, 0.0 }
 0x273   :  { %v2403_v19 = vmax.f32 %v1813_v61, 0.0  ;;  %v2678_v1 = vadd.f32 %v2677_v59, %v2402_v57  ;;  %v1816_v2 = vadd.f32 %v5260_v43, %v1815_v63 }
 0x274   :  { %v2406_v12 = vmax.f32 %v1824_v4, 0.0 }
 0x275   :  { %v2679_v3 = vadd.f32 %v2678_v1, %v2403_v19  ;;  %v2404_v5 = vmax.f32 %v1816_v2, 0.0 }
 0x277   :  { %v2680_v7 = vadd.f32 %v2679_v3, %v2404_v5  ;;  %v4396_v9 = vpop.f32.mrb[148].mxu0 }
 0x278   :  { %v1828_v11 = vpop.f32.mrb[149].mxu0  ;;  %v1837_v22 = vadd.f32 %v5260_v43, %v4396_v9 }
 0x279   :  { %v2681_v14 = vadd.f32 %v2680_v7, %v2405_v6  ;;  %v1829_v15 = vadd.f32 %v5260_v43, %v1828_v11  ;;  %v4397_v16 = vpop.f32.mrb[150].mxu0 }
 0x27a   :  { %v1831_v21 = vpop.f32.mrb[151].mxu0  ;;  %v1840_v28 = vadd.f32 %v5260_v43, %v4397_v16  ;;  %v2409_v31 = vmax.f32 %v1837_v22, 0.0 }
 0x27b   :  { %v2407_v23 = vmax.f32 %v1829_v15, 0.0  ;;  %v2682_v24 = vadd.f32 %v2681_v14, %v2406_v12  ;;  %v1832_v25 = vadd.f32 %v5260_v43, %v1831_v21 }
 0x27c   :  { %v2410_v35 = vmax.f32 %v1840_v28, 0.0 }
 0x27d   :  { %v2683_v27 = vadd.f32 %v2682_v24, %v2407_v23  ;;  %v2408_v30 = vmax.f32 %v1832_v25, 0.0 }
 0x27f   :  { %v2684_v47 = vadd.f32 %v2683_v27, %v2408_v30  ;;  %v4400_v32 = vpop.f32.mrb[152].mxu0 }
 0x280   :  { %v1844_v34 = vpop.f32.mrb[153].mxu0  ;;  %v1853_v44 = vadd.f32 %v5260_v43, %v4400_v32 }
 0x281   :  { %v2685_v36 = vadd.f32 %v2684_v47, %v2409_v31  ;;  %v1845_v40 = vadd.f32 %v5260_v43, %v1844_v34  ;;  %v4401_v41 = vpop.f32.mrb[154].mxu0 }
 0x282   :  { %v1847_v39 = vpop.f32.mrb[155].mxu0  ;;  %v1856_v52 = vadd.f32 %v5394_v50, %v4401_v41  ;;  %v2413_v55 = vmax.f32 %v1853_v44, 0.0 }
 0x283   :  { %v2411_v46 = vmax.f32 %v1845_v40, 0.0  ;;  %v2686_v48 = vadd.f32 %v2685_v36, %v2410_v35  ;;  %v1848_v29 = vadd.f32 %v5260_v43, %v1847_v39 }
 0x284   :  { %v2414_v61 = vmax.f32 %v1856_v52, 0.0 }
 0x285   :  { %v2687_v49 = vadd.f32 %v2686_v48, %v2411_v46  ;;  %v2412_v54 = vmax.f32 %v1848_v29, 0.0 }
 0x287   :  { %v2688_v56 = vadd.f32 %v2687_v49, %v2412_v54  ;;  %v4404_v57 = vpop.f32.mrb[156].mxu0 }
 0x288   :  { %v1860_v59 = vpop.f32.mrb[157].mxu0  ;;  %v1869_v43 = vadd.f32 %v5394_v50, %v4404_v57 }
 0x289   :  { %v2689_v62 = vadd.f32 %v2688_v56, %v2413_v55  ;;  %v1861_v63 = vadd.f32 %v5394_v50, %v1860_v59  ;;  %v4405_v0 = vpop.f32.mrb[158].mxu0 }
 0x28a   :  { %v1863_v19 = vpop.f32.mrb[159].mxu0  ;;  %v1872_v5 = vadd.f32 %v5394_v50, %v4405_v0  ;;  %v2417_v7 = vmax.f32 %v1869_v43, 0.0 }
 0x28b   :  { %v2415_v1 = vmax.f32 %v1861_v63, 0.0  ;;  %v2690_v2 = vadd.f32 %v2689_v62, %v2414_v61  ;;  %v1864_v3 = vadd.f32 %v5394_v50, %v1863_v19 }
 0x28c   :  { %v2418_v14 = vmax.f32 %v1872_v5, 0.0 }
 0x28d   :  { %v2691_v4 = vadd.f32 %v2690_v2, %v2415_v1  ;;  %v2416_v6 = vmax.f32 %v1864_v3, 0.0 }
 0x28f   :  { %v2692_v9 = vadd.f32 %v2691_v4, %v2416_v6  ;;  %v4408_v11 = vpop.f32.mrb[160].mxu0 }
 0x290   :  { %v1876_v12 = vpop.f32.mrb[161].mxu0  ;;  %v1885_v24 = vadd.f32 %v5394_v50, %v4408_v11 }
 0x291   :  { %v2693_v15 = vadd.f32 %v2692_v9, %v2417_v7  ;;  %v1877_v16 = vadd.f32 %v5394_v50, %v1876_v12  ;;  %v4409_v21 = vpop.f32.mrb[162].mxu0 }
 0x292   :  { %v1879_v22 = vpop.f32.mrb[163].mxu0  ;;  %v1888_v30 = vadd.f32 %v5394_v50, %v4409_v21  ;;  %v2421_v32 = vmax.f32 %v1885_v24, 0.0 }
 0x293   :  { %v2694_v23 = vadd.f32 %v2693_v15, %v2418_v14  ;;  %v1880_v25 = vadd.f32 %v5394_v50, %v1879_v22  ;;  %v2419_v28 = vmax.f32 %v1877_v16, 0.0 }
 0x294   :  { %v2422_v41 = vmax.f32 %v1888_v30, 0.0 }
 0x295   :  { %v2695_v27 = vrot.slane %v2694_v23, 4  ;;  %v2420_v31 = vmax.f32 %v1880_v25, 0.0 }
 0x297   :  { %v2696_v47 = vadd.f32 %v2695_v27, %v2694_v23  ;;  %v2701_v34 = vadd.f32 %v2420_v31, %v2419_v28  ;;  %v4412_v35 = vpop.f32.mrb[164].mxu0 }
 0x298   :  { %v1892_v36 = vpop.f32.mrb[165].mxu0  ;;  %v1901_v48 = vadd.f32 %v5394_v50, %v4412_v35 }
 0x299   :  { %v2697_v40 = vrot.slane %v2696_v47, 2  ;;  %v2702_v39 = vadd.f32 %v2701_v34, %v2421_v32  ;;  %v1893_v44 = vadd.f32 %v5394_v50, %v1892_v36  ;;  %v4413_v46 = vpop.f32.mrb[166].mxu0 }
 0x29a   :  { %v1895_v29 = vpop.f32.mrb[167].mxu0  ;;  %v1904_v59 = vadd.f32 %v5394_v50, %v4413_v46  ;;  %v2425_v63 = vmax.f32 %v1901_v48, 0.0 }
 0x29b   :  { %v2698_v49 = vadd.f32 %v2697_v40, %v2696_v47  ;;  %v2423_v52 = vmax.f32 %v1893_v44, 0.0  ;;  %v2703_v54 = vadd.f32 %v2702_v39, %v2422_v41  ;;  %v1896_v55 = vadd.f32 %v5394_v50, %v1895_v29 }
 0x29c   :  { %v2426_v2 = vmax.f32 %v1904_v59, 0.0 }
 0x29d   :  { %v2699_v56 = vrot.slane %v2698_v49, 1  ;;  %v2704_v57 = vadd.f32 %v2703_v54, %v2423_v52  ;;  %v2424_v61 = vmax.f32 %v1896_v55, 0.0 }
 0x29f   :  { %v2700_v62 = vadd.f32 %v2699_v56, %v2698_v49  ;;  %v2705_v0 = vadd.f32 %v2704_v57, %v2424_v61  ;;  %v4416_v19 = vpop.f32.mrb[168].mxu0 }
 0x2a0   :  { %v1908_v43 = vpop.f32.mrb[169].mxu0  ;;  %v1917_v7 = vadd.f32 %v5394_v50, %v4416_v19 }
 0x2a1   :  { %v5410_v1 = vsel %vm2826_vm3, %v2700_v62, %v5370_v10  ;;  %v2706_v3 = vadd.f32 %v2705_v0, %v2425_v63  ;;  %v1909_v4 = vadd.f32 %v5394_v50, %v1908_v43  ;;  %v4417_v5 = vpop.f32.mrb[170].mxu0  ;;  %v1957_v0 = vadd.f32 %v5394_v50, %v5182_v17 }
 0x2a2   :  { %v1911_v6 = vpop.f32.mrb[171].mxu0  ;;  %v1920_v15 = vadd.f32 %v5394_v50, %v4417_v5  ;;  %v2429_v21 = vmax.f32 %v1917_v7, 0.0  ;;  %v1965_v5 = vadd.f32 %v5394_v50, %v5180_v13  ;;  %v1973_v17 = vadd.f32 %v5394_v50, %v5194_v37 }
 0x2a3   :  { %v2427_v9 = vmax.f32 %v1909_v4, 0.0  ;;  %v2707_v11 = vadd.f32 %v2706_v3, %v2426_v2  ;;  %v1912_v12 = vadd.f32 %v5394_v50, %v1911_v6  ;;  %v1960_v2 = vadd.f32 %v5394_v50, %v5187_v26 }
 0x2a4   :  { %v2430_v24 = vmax.f32 %v1920_v15, 0.0  ;;  %v2439_v6 = vmax.f32 %v1957_v0, 0.0  ;;  %v1976_v26 = vadd.f32 %v5394_v50, %v5198_v42  ;;  %v1981_v13 = vadd.f32 %v5394_v50, %v5191_v33 }
 0x2a5   :  { %v2708_v14 = vadd.f32 %v2707_v11, %v2427_v9  ;;  %v2428_v16 = vmax.f32 %v1912_v12, 0.0  ;;  %v1968_v9 = vadd.f32 %v5394_v50, %v5184_v20  ;;  %v2440_v11 = vmax.f32 %v1960_v2, 0.0  ;;  %v4702_v2 = vld [vmem:[#allocation8 + $0x2c] ss:$16 sps:$4 sm:$0xff]  }
 0x2a6   :  { %v1984_v20 = vadd.f32 %v5394_v50, %v5196_v38  ;;  %v1989_v37 = vadd.f32 %v5394_v50, %v5203_v51  ;;  %v1992_v42 = vadd.f32 %v5394_v50, %v5209_v58  ;;  %v1997_v33 = vadd.f32 %v5394_v50, %v5200_v45 }
 0x2a7   :  { %v2709_v22 = vadd.f32 %v2708_v14, %v2428_v16  ;;  %v4420_v10 = vpop.f32.mrb[172].mxu0  ;;  %v2441_v14 = vmax.f32 %v1965_v5, 0.0  ;;  %v2442_v16 = vmax.f32 %v1968_v9, 0.0  ;;  %v2000_v38 = vadd.f32 %v5394_v50, %v5205_v53  ;;  %v4703_v5 = vld [vmem:[#allocation8 + $0x48] ss:$16 sps:$4 sm:$0xff]  }
 0x2a8   :  { %v1924_v23 = vpop.f32.mrb[173].mxu0  ;;  %v1933_v31 = vadd.f32 %v5394_v50, %v4420_v10  ;;  %v2806_v51 = vrot.slane %v5358_v8, 4  ;;  %v4709_v9 = vld [vmem:[#allocation8 + $0x88] ss:$16 sps:$4 sm:$0xff]  }
 0x2a9   :  { %v2710_v25 = vadd.f32 %v2709_v22, %v2429_v21  ;;  %v1925_v27 = vadd.f32 %v5394_v50, %v1924_v23  ;;  %v4421_v28 = vpop.f32.mrb[174].mxu0  ;;  %v2443_v22 = vmax.f32 %v1973_v17, 0.0  ;;  %v2444_v23 = vmax.f32 %v1976_v26, 0.0  ;;  %v4720_v17 = vld [vmem:[#allocation8 + $0xec] ss:$16 sps:$4 sm:$0xff]  }
 0x2aa   :  { %v1927_v30 = vpop.f32.mrb[175].mxu0  ;;  %v1936_v36 = vadd.f32 %v5394_v50, %v4421_v28  ;;  %v2433_v41 = vmax.f32 %v1933_v31, 0.0  ;;  %v2446_v28 = vmax.f32 %v1984_v20, 0.0  ;;  %v2447_v31 = vmax.f32 %v1989_v37, 0.0  ;;  %v4721_v26 = vld [vmem:[#allocation9] ss:$8 sps:$4 sm:$0xff]  }
 0x2ab   :  { %v2431_v47 = vmax.f32 %v1925_v27, 0.0  ;;  %v2711_v32 = vadd.f32 %v2710_v25, %v2430_v24  ;;  %v1928_v34 = vadd.f32 %v5394_v50, %v1927_v30  ;;  %v2445_v25 = vmax.f32 %v1981_v13, 0.0  ;;  %v4724_v13 = vld [vmem:[#allocation9 + $0x10] ss:$8 sps:$4 sm:$0xff]   ;;  %v4732_v20 = vld [vmem:[#allocation9 + $0x34] ss:$8 sps:$4 sm:$0xff]  }
 0x2ac   :  { %v2434_v48 = vmax.f32 %v1936_v36, 0.0  ;;  %v2449_v36 = vmax.f32 %v1997_v33, 0.0  ;;  %v2450_v58 = vmax.f32 %v2000_v38, 0.0  ;;  %v4738_v37 = vld [vmem:[#allocation9 + $0x54] ss:$8 sps:$4 sm:$0xff]  }
 0x2ad   :  { %v2712_v35 = vadd.f32 %v2711_v32, %v2431_v47  ;;  %v2432_v40 = vmax.f32 %v1928_v34, 0.0  ;;  %v2769_v32 = vrot.slane %v5293_v60, 4  ;;  %v2448_v34 = vmax.f32 %v1992_v42, 0.0  ;;  %v4739_v42 = vld [vmem:[#allocation9 + $0x60] ss:$8 sps:$4 sm:$0xff]  }
 0x2ae   :  { %v4742_v33 = vld [vmem:[#allocation9 + $0x70] ss:$8 sps:$4 sm:$0xff]  }
 0x2af   :  { %v2713_v39 = vadd.f32 %v2712_v35, %v2432_v40  ;;  %v4424_v44 = vpop.f32.mrb[176].mxu0  ;;  %v4748_v38 = vld [vmem:[#allocation9 + $0x90] ss:$8 sps:$4 sm:$0xff]  }
 0x2b0   :  { %v1940_v46 = vpop.f32.mrb[177].mxu0  ;;  %v1949_v55 = vadd.f32 %v5394_v50, %v4424_v44  ;;  %v2807_v44 = vadd.f32 %v2806_v51, %v5358_v8  ;;  %v4756_v51 = vld [vmem:[#allocation9 + $0xb4] ss:$8 sps:$4 sm:$0xff]  }
 0x2b1   :  { %v2714_v29 = vadd.f32 %v2713_v39, %v2433_v41  ;;  %v1941_v49 = vadd.f32 %v5394_v50, %v1940_v46  ;;  %v4425_v52 = vpop.f32.mrb[178].mxu0  ;;  %v2770_v41 = vadd.f32 %v2769_v32, %v5293_v60  ;;  %v4750_v32 = vld [vmem:[#allocation9 + $0x94] ss:$8 sps:$4 sm:$0xff]  }
 0x2b2   :  { %v1943_v54 = vpop.f32.mrb[179].mxu0  ;;  %v1952_v62 = vadd.f32 %v5394_v50, %v4425_v52  ;;  %v2437_v19 = vmax.f32 %v1949_v55, 0.0 }
 0x2b3   :  { %v2435_v56 = vmax.f32 %v1941_v49, 0.0  ;;  %v2715_v57 = vadd.f32 %v2714_v29, %v2434_v48  ;;  %v1944_v59 = vadd.f32 %v5394_v50, %v1943_v54  ;;  %v2771_v46 = vrot.slane %v2770_v41, 2 }
 0x2b4   :  { %v2438_v3 = vmax.f32 %v1952_v62, 0.0  ;;  %v2808_v48 = vrot.slane %v2807_v44, 2 }
 0x2b5   :  { %v2716_v61 = vadd.f32 %v2715_v57, %v2435_v56  ;;  %v2436_v63 = vmax.f32 %v1944_v59, 0.0  ;;  %v2772_v52 = vadd.f32 %v2771_v46, %v2770_v41  ;;  %v4757_v41 = vld [vmem:[#allocation9 + $0xc0] ss:$8 sps:$4 sm:$0xff]   ;;  %v4768_v46 = vld [vmem:[#allocation9 + $0xf4] ss:$8 sps:$4 sm:$0xff]  }
 0x2b6   :  { %v2809_v54 = vadd.f32 %v2808_v48, %v2807_v44  ;;  %v4765_v44 = vld [vmem:[#allocation9 + $0xe4] ss:$8 sps:$4 sm:$0xff]   ;;  %v4766_v48 = vld [vmem:[#allocation9 + $0xf0] ss:$8 sps:$4 sm:$0xff]  }
 0x2b7   :  { %v2717_v43 = vadd.f32 %v2716_v61, %v2436_v63  ;;  %v2773_v55 = vrot.slane %v2772_v52, 1 }
 0x2b8   :  { %v2810_v56 = vrot.slane %v2809_v54, 1 }
 0x2b9   :  { %v2718_v4 = vadd.f32 %v2717_v43, %v2437_v19  ;;  %v2774_v60 = vadd.f32 %v2773_v55, %v2772_v52  ;;  %v4697_v19 = vld [vmem:[#allocation8 + $0x8] ss:$16 sps:$4 sm:$0xff]  }
 0x2ba   :  { %v2811_v61 = vadd.f32 %v2810_v56, %v2809_v54 }
 0x2bb   :  { %v2719_v7 = vadd.f32 %v2718_v4, %v2438_v3  ;;  %v4700_v3 = vld [vmem:[#allocation8 + $0x28] ss:$16 sps:$4 sm:$0xff]   ;;  %v4705_v4 = vld [vmem:[#allocation8 + $0x4c] ss:$16 sps:$4 sm:$0xff]  }
 0x2bd   :  { %v2720_v12 = vadd.f32 %v2719_v7, %v2439_v6  ;;  %v4708_v6 = vld [vmem:[#allocation8 + $0x6c] ss:$16 sps:$4 sm:$0xff]   ;;  %v4706_v7 = vld [vmem:[#allocation8 + $0x68] ss:$16 sps:$4 sm:$0xff]  }
 0x2bf   :  { %v2721_v15 = vadd.f32 %v2720_v12, %v2440_v11  ;;  %v4714_v11 = vld [vmem:[#allocation8 + $0xac] ss:$16 sps:$4 sm:$0xff]   ;;  %v4712_v12 = vld [vmem:[#allocation8 + $0xa8] ss:$16 sps:$4 sm:$0xff]  }
 0x2c1   :  { %v2722_v21 = vadd.f32 %v2721_v15, %v2441_v14  ;;  %v4717_v14 = vld [vmem:[#allocation8 + $0xcc] ss:$16 sps:$4 sm:$0xff]   ;;  %v4718_v15 = vld [vmem:[#allocation8 + $0xe8] ss:$16 sps:$4 sm:$0xff]  }
 0x2c3   :  { %v2723_v10 = vadd.f32 %v2722_v21, %v2442_v16  ;;  %v4723_v16 = vld [vmem:[#allocation9 + $0x4] ss:$8 sps:$4 sm:$0xff]   ;;  %v4726_v21 = vld [vmem:[#allocation9 + $0x14] ss:$8 sps:$4 sm:$0xff]  }
 0x2c5   :  { %v2724_v24 = vadd.f32 %v2723_v10, %v2443_v22  ;;  %v4729_v22 = vld [vmem:[#allocation9 + $0x24] ss:$8 sps:$4 sm:$0xff]   ;;  %v4727_v10 = vld [vmem:[#allocation9 + $0x20] ss:$8 sps:$4 sm:$0xff]  }
 0x2c7   :  { %v2725_v27 = vadd.f32 %v2724_v24, %v2444_v23  ;;  %v4730_v23 = vld [vmem:[#allocation9 + $0x30] ss:$8 sps:$4 sm:$0xff]   ;;  %v4735_v24 = vld [vmem:[#allocation9 + $0x44] ss:$8 sps:$4 sm:$0xff]  }
 0x2c9   :  { %v2726_v30 = vadd.f32 %v2725_v27, %v2445_v25  ;;  %v4733_v25 = vld [vmem:[#allocation9 + $0x40] ss:$8 sps:$4 sm:$0xff]   ;;  %v4736_v27 = vld [vmem:[#allocation9 + $0x50] ss:$8 sps:$4 sm:$0xff]  }
 0x2cb   :  { %v2727_v47 = vadd.f32 %v2726_v30, %v2446_v28  ;;  %v4741_v28 = vld [vmem:[#allocation9 + $0x64] ss:$8 sps:$4 sm:$0xff]   ;;  %v4744_v30 = vld [vmem:[#allocation9 + $0x74] ss:$8 sps:$4 sm:$0xff]  }
 0x2cd   :  { %v2728_v35 = vadd.f32 %v2727_v47, %v2447_v31  ;;  %v4747_v31 = vld [vmem:[#allocation9 + $0x84] ss:$8 sps:$4 sm:$0xff]   ;;  %v4745_v47 = vld [vmem:[#allocation9 + $0x80] ss:$8 sps:$4 sm:$0xff]  }
 0x2cf   :  { %v2729_v40 = vadd.f32 %v2728_v35, %v2448_v34  ;;  %v4753_v34 = vld [vmem:[#allocation9 + $0xa4] ss:$8 sps:$4 sm:$0xff]   ;;  %v4751_v35 = vld [vmem:[#allocation9 + $0xa0] ss:$8 sps:$4 sm:$0xff]  }
 0x2d1   :  { %v2730_v39 = vadd.f32 %v2729_v40, %v2449_v36  ;;  %v4754_v36 = vld [vmem:[#allocation9 + $0xb0] ss:$8 sps:$4 sm:$0xff]   ;;  %v4759_v40 = vld [vmem:[#allocation9 + $0xc4] ss:$8 sps:$4 sm:$0xff]  }
 0x2d3   :  { %v2731_v45 = vadd.f32 %v2730_v39, %v2450_v58  ;;  %v4762_v58 = vld [vmem:[#allocation9 + $0xd4] ss:$8 sps:$4 sm:$0xff]   ;;  %v4760_v39 = vld [vmem:[#allocation9 + $0xd0] ss:$8 sps:$4 sm:$0xff]  }
 0x2d5   :  { %v2732_v29 = vrot.slane %v2731_v45, 4 }
 0x2d7   :  { %v2733_v49 = vadd.f32 %v2732_v29, %v2731_v45  ;;  %v4763_v45 = vld [vmem:[#allocation9 + $0xe0] ss:$8 sps:$4 sm:$0xff]   ;;  %v4771_v29 = vld [vmem:[#allocation9 + $0x104] ss:$8 sps:$4 sm:$0xff]  }
 0x2d9   :  { %v2734_v53 = vrot.slane %v2733_v49, 2 }
 0x2db   :  { %v2735_v50 = vadd.f32 %v2734_v53, %v2733_v49  ;;  %v2877_v49 = vlaneseq  ;;  %v5460_v53 = vld [vmem:[%s5499_s4] sm:$0xf] }
 0x2dd   :  { %v2736_v57 = vrot.slane %v2735_v50, 1  ;;  %v5454_v52 = vshrl.u32 %v2877_v49, 7  ;;  %v4819_v49 = vld [vmem:[#allocation11 + $0x48] sm:$0xff]  }
 0x2df   :  { %v2737_v59 = vadd.f32 %v2736_v57, %v2735_v50  ;;  %v2879_v54 = vsub.s32 0, %v5454_v52  ;;  %v2883_v50 = vsub.s32 1, %v5454_v52 }
 0x2e1   :  { %v2829_v8 = vsel %vm2828_vm4, %v2737_v59, %v5410_v1  ;;  %v4711_v1 = vld [vmem:[#allocation8 + $0x8c] ss:$16 sps:$4 sm:$0xff]   ;;  %v2880_v55 = vrot.slane %v5460_v53, %v2879_v54  ;;  %v2884_v56 = vrot.slane %v5460_v53, %v2883_v50 }
 0x2e2   :  { %v2831_v62 = vsel %vm2830_vm5, %v2774_v60, %v2829_v8 }
 0x2e3   :  { %v2833_v63 = vsel %vm2832_vm6, %v2811_v61, %v2831_v62 }
 0x2e4   :  { %v2841_v0 = vmul.f32 0.00390625, %v2833_v63 }
 0x2e6   :  { %v2842_v43 = vpack.c.bf16 %v2841_v0, %v2841_v0 }
 0x2e8   :  { %3090 = vmatmul.mubr.bf16.vlgmr.msra.gmra.mrb[76].mxu1 %v2842_v43 }
 0x2e9   :  { %3099 = vmatpush1.bf16.msra.mxu1 %v4697_v19  ;;  %3130 = vmatprep.mubr.bf16.mxu1 %v4986_v18  ;;  %v4715_v18 = vld [vmem:[#allocation8 + $0xc8] ss:$16 sps:$4 sm:$0xff]  }
 0x2ea   :  { %3100 = vmatprep.subr.bf16.mxu1 %v4702_v2 }
 0x2ed   :  { %3101 = vmatpush1.bf16.msra.mxu1 %v4700_v3  ;;  %v4774_v3 = vld [vmem:[#allocation9 + $0x114] ss:$8 sps:$4 sm:$0xff]  }
 0x2ee   :  { %3102 = vmatprep.subr.bf16.mxu1 %v4705_v4  ;;  %v4772_v4 = vld [vmem:[#allocation9 + $0x110] ss:$8 sps:$4 sm:$0xff]  }
 0x2f1   :  { %3103 = vmatpush1.bf16.msra.mxu1 %v4703_v5  ;;  %v4777_v5 = vld [vmem:[#allocation9 + $0x124] ss:$8 sps:$4 sm:$0xff]  }
 0x2f2   :  { %3104 = vmatprep.subr.bf16.mxu1 %v4708_v6  ;;  %v4775_v6 = vld [vmem:[#allocation9 + $0x120] ss:$8 sps:$4 sm:$0xff]  }
 0x2f5   :  { %3105 = vmatpush1.bf16.msra.mxu1 %v4706_v7  ;;  %v4780_v7 = vld [vmem:[#allocation9 + $0x134] ss:$8 sps:$4 sm:$0xff]  }
 0x2f6   :  { %3106 = vmatprep.subr.bf16.mxu1 %v4711_v1  ;;  %v4778_v1 = vld [vmem:[#allocation9 + $0x130] ss:$8 sps:$4 sm:$0xff]  }
 0x2f9   :  { %3107 = vmatpush1.bf16.msra.mxu1 %v4709_v9  ;;  %v4783_v9 = vld [vmem:[#allocation9 + $0x144] ss:$8 sps:$4 sm:$0xff]  }
 0x2fa   :  { %3108 = vmatprep.subr.bf16.mxu1 %v4714_v11  ;;  %v4781_v11 = vld [vmem:[#allocation9 + $0x140] ss:$8 sps:$4 sm:$0xff]  }
 0x2fd   :  { %3109 = vmatpush1.bf16.msra.mxu1 %v4712_v12  ;;  %v4786_v12 = vld [vmem:[#allocation9 + $0x154] ss:$8 sps:$4 sm:$0xff]  }
 0x2fe   :  { %3110 = vmatprep.subr.bf16.mxu1 %v4717_v14  ;;  %v4784_v14 = vld [vmem:[#allocation9 + $0x150] ss:$8 sps:$4 sm:$0xff]  }
 0x301   :  { %3111 = vmatpush1.bf16.msra.mxu1 %v4715_v18  ;;  %v2891_v18 = vsub.s32 3, %v5454_v52 }
 0x302   :  { %3112 = vmatprep.subr.bf16.mxu1 %v4720_v17  ;;  %v4789_v17 = vld [vmem:[#allocation9 + $0x164] ss:$8 sps:$4 sm:$0xff]  }
 0x305   :  { %3113 = vmatpush1.bf16.msra.mxu1 %v4718_v15  ;;  %v2892_v15 = vrot.slane %v5460_v53, %v2891_v18 }
 0x306   :  { %3543 = vmatprep.subr.bf16.mxu1 %v4723_v16  ;;  %v4787_v16 = vld [vmem:[#allocation9 + $0x160] ss:$8 sps:$4 sm:$0xff]  }
 0x308   :  { %3131 = vmatmul.mubr.bf16.vlgmr.msra.gmra.mrb[80].mxu1 %v2842_v43  ;;  %v4769_v43 = vld [vmem:[#allocation9 + $0x100] ss:$8 sps:$4 sm:$0xff]  }
 0x309   :  { %3544 = vmatpush1.bf16.msra.mxu1 %v4721_v26  ;;  %v4792_v26 = vld [vmem:[#allocation9 + $0x174] ss:$8 sps:$4 sm:$0xff]  }
 0x30a   :  { %3545 = vmatprep.subr.bf16.mxu1 %v4726_v21 }
 0x30d   :  { %3546 = vmatpush1.bf16.msra.mxu1 %v4724_v13 }
 0x30e   :  { %3547 = vmatprep.subr.bf16.mxu1 %v4729_v22 }
 0x311   :  { %3548 = vmatpush1.bf16.msra.mxu1 %v4727_v10 }
 0x312   :  { %3549 = vmatprep.subr.bf16.mxu1 %v4732_v20  ;;  %v4790_v20 = vld [vmem:[#allocation9 + $0x170] ss:$8 sps:$4 sm:$0xff]  }
 0x315   :  { %3550 = vmatpush1.bf16.msra.mxu1 %v4730_v23 }
 0x316   :  { %3551 = vmatprep.subr.bf16.mxu1 %v4735_v24  ;;  %v4795_v24 = vld [vmem:[#allocation9 + $0x184] ss:$8 sps:$4 sm:$0xff]  }
 0x319   :  { %3552 = vmatpush1.bf16.msra.mxu1 %v4733_v25 }
 0x31a   :  { %3553 = vmatprep.subr.bf16.mxu1 %v4738_v37 }
 0x31d   :  { %3554 = vmatpush1.bf16.msra.mxu1 %v4736_v27  ;;  %v4793_v27 = vld [vmem:[#allocation9 + $0x180] ss:$8 sps:$4 sm:$0xff]  }
 0x31e   :  { %3555 = vmatprep.subr.bf16.mxu1 %v4741_v28  ;;  %v4798_v28 = vld [vmem:[#allocation9 + $0x194] ss:$8 sps:$4 sm:$0xff]  }
 0x321   :  { %3556 = vmatpush1.bf16.msra.mxu1 %v4739_v42  ;;  %v4796_v42 = vld [vmem:[#allocation9 + $0x190] ss:$8 sps:$4 sm:$0xff]  }
 0x322   :  { %3557 = vmatprep.subr.bf16.mxu1 %v4744_v30  ;;  %v4801_v30 = vld [vmem:[#allocation9 + $0x1a4] ss:$8 sps:$4 sm:$0xff]  }
 0x325   :  { %3558 = vmatpush1.bf16.msra.mxu1 %v4742_v33  ;;  %v4799_v33 = vld [vmem:[#allocation9 + $0x1a0] ss:$8 sps:$4 sm:$0xff]  }
 0x326   :  { %3559 = vmatprep.subr.bf16.mxu1 %v4747_v31  ;;  %v4804_v31 = vld [vmem:[#allocation9 + $0x1b4] ss:$8 sps:$4 sm:$0xff]  }
 0x329   :  { %3560 = vmatpush1.bf16.msra.mxu1 %v4745_v47  ;;  %v4802_v47 = vld [vmem:[#allocation9 + $0x1b0] ss:$8 sps:$4 sm:$0xff]  }
 0x32a   :  { %3561 = vmatprep.subr.bf16.mxu1 %v4750_v32  ;;  %v4807_v32 = vld [vmem:[#allocation9 + $0x1c4] ss:$8 sps:$4 sm:$0xff]  }
 0x32d   :  { %3562 = vmatpush1.bf16.msra.mxu1 %v4748_v38  ;;  %v4805_v38 = vld [vmem:[#allocation9 + $0x1c0] ss:$8 sps:$4 sm:$0xff]  }
 0x32e   :  { %3563 = vmatprep.subr.bf16.mxu1 %v4753_v34  ;;  %v2887_v34 = vsub.s32 2, %v5454_v52 }
 0x331   :  { %3564 = vmatpush1.bf16.msra.mxu1 %v4751_v35  ;;  %v4810_v35 = vld [vmem:[#allocation9 + $0x1d4] ss:$8 sps:$4 sm:$0xff]  }
 0x332   :  { %3565 = vmatprep.subr.bf16.mxu1 %v4756_v51  ;;  %v4808_v51 = vld [vmem:[#allocation9 + $0x1d0] ss:$8 sps:$4 sm:$0xff]  }
 0x335   :  { %3566 = vmatpush1.bf16.msra.mxu1 %v4754_v36  ;;  %v2888_v36 = vrot.slane %v5460_v53, %v2887_v34  ;;  %v4820_v53 = vld [vmem:[#allocation11 + $0x8] sm:$0xff]  }
 0x336   :  { %3567 = vmatprep.subr.bf16.mxu1 %v4759_v40  ;;  %v4813_v40 = vld [vmem:[#allocation9 + $0x1e4] ss:$8 sps:$4 sm:$0xff]  }
 0x339   :  { %3568 = vmatpush1.bf16.msra.mxu1 %v4757_v41  ;;  %v4811_v41 = vld [vmem:[#allocation9 + $0x1e0] ss:$8 sps:$4 sm:$0xff]  }
 0x33a   :  { %3569 = vmatprep.subr.bf16.mxu1 %v4762_v58 }
 0x33d   :  { %3570 = vmatpush1.bf16.msra.mxu1 %v4760_v39  ;;  %v4816_v39 = vld [vmem:[#allocation9 + $0x1f4] ss:$8 sps:$4 sm:$0xff]  }
 0x33e   :  { %3571 = vmatprep.subr.bf16.mxu1 %v4765_v44  ;;  %v4814_v44 = vld [vmem:[#allocation9 + $0x1f0] ss:$8 sps:$4 sm:$0xff]  }
 0x341   :  { %3572 = vmatpush1.bf16.msra.mxu1 %v4763_v45 }
 0x342   :  { %3573 = vmatprep.subr.bf16.mxu1 %v4768_v46  ;;  %v4817_v46 = vld [vmem:[#allocation11 + $0x40] sm:$0xff]  }
 0x345   :  { %3574 = vmatpush1.bf16.msra.mxu1 %v4766_v48  ;;  %v4818_v48 = vld [vmem:[#allocation11] sm:$0xff]  }
 0x346   :  { %3584 = vmatprep.subr.bf16.mxu1 %v4771_v29 }
 0x3bb   :  { %v3091_v57 = vpop.f32.mrb[76].mxu1 }
 0x3bc   :  { %v3092_v59 = vadd.f32 %v3091_v57, %v2880_v55  ;;  %v3093_v60 = vpop.f32.mrb[77].mxu1  ;;  %v4821_v55 = vld [vmem:[#allocation11 + $0x50] sm:$0xff]   ;;  %v4823_v57 = vld [vmem:[#allocation11 + $0x58] sm:$0xff]  }
 0x3bd   :  { %v3094_v61 = vadd.f32 %v3093_v60, %v2884_v56  ;;  %v3095_v8 = vpop.f32.mrb[78].mxu1  ;;  %v4822_v56 = vld [vmem:[#allocation11 + $0x10] sm:$0xff]   ;;  %v4825_v60 = vld [vmem:[#allocation11 + $0x60] sm:$0xff]  }
 0x3be   :  { %v3139_v62 = vmax.f32 %v3092_v59, 0.0  ;;  %v3096_v63 = vpop.f32.mrb[79].mxu1  ;;  %v4824_v59 = vld [vmem:[#allocation11 + $0x18] sm:$0xff]   ;;  %v4827_v8 = vld [vmem:[#allocation11 + $0x68] sm:$0xff]  }
 0x3bf   :  { %v3140_v0 = vmax.f32 %v3094_v61, 0.0  ;;  %v4826_v61 = vld [vmem:[#allocation11 + $0x20] sm:$0xff]   ;;  %v4829_v63 = vld [vmem:[#allocation11 + $0x70] sm:$0xff]  }
 0x3c0   :  { %v3143_v2 = vpack.c.bf16 %v3139_v62, %v3139_v62  ;;  %v4828_v62 = vld [vmem:[#allocation11 + $0x28] sm:$0xff]  }
 0x3c1   :  { %v3144_v19 = vpack.c.bf16 %v3140_v0, %v3140_v0  ;;  %v4830_v0 = vld [vmem:[#allocation11 + $0x30] sm:$0xff]  }
 0x3c3   :  { %3575 = vmatprep.mubr.bf16.mxu1 %v3144_v19  ;;  %v4831_v19 = vld [vmem:[#allocation11 + $0x78] sm:$0xff]  }
 0x3c4   :  { %3576 = vmatmul.mubr.bf16.vlgmr.msra.gmra.mrb[84].mxu1 %v3143_v2  ;;  %v3211_v2 = vld [vmem:[%s5501_s6] sm:$0x3] }
 0x3c5   :  { %3585 = vmatpush1.bf16.msra.mxu1 %v4769_v43  ;;  %v4832_v43 = vld [vmem:[#allocation11 + $0x38] sm:$0xff]  }
 0x3c6   :  { %3586 = vmatprep.subr.bf16.mxu1 %v4774_v3  ;;  %v3216_v3 = vrot.slane %v3211_v2, %v2879_v54  ;;  %v4055_v54 = vld [vmem:[%s5503_s8] ss:$0 sm:$0xff] }
 0x3c9   :  { %3587 = vmatpush1.bf16.msra.mxu1 %v4772_v4  ;;  %v3220_v4 = vrot.slane %v3211_v2, %v2883_v50 }
 0x3ca   :  { %3588 = vmatprep.subr.bf16.mxu1 %v4777_v5 }
 0x3cd   :  { %3589 = vmatpush1.bf16.msra.mxu1 %v4775_v6 }
 0x3ce   :  { %3590 = vmatprep.subr.bf16.mxu1 %v4780_v7 }
 0x3d1   :  { %3591 = vmatpush1.bf16.msra.mxu1 %v4778_v1 }
 0x3d2   :  { %3592 = vmatprep.subr.bf16.mxu1 %v4783_v9 }
 0x3d5   :  { %3593 = vmatpush1.bf16.msra.mxu1 %v4781_v11 }
 0x3d6   :  { %3594 = vmatprep.subr.bf16.mxu1 %v4786_v12 }
 0x3d9   :  { %3595 = vmatpush1.bf16.msra.mxu1 %v4784_v14 }
 0x3da   :  { %3596 = vmatprep.subr.bf16.mxu1 %v4789_v17 }
 0x3db   :  { %v3132_v21 = vpop.f32.mrb[80].mxu1 }
 0x3dc   :  { %v3134_v13 = vpop.f32.mrb[81].mxu1  ;;  %v3133_v58 = vadd.f32 %v3132_v21, %v2888_v36 }
 0x3dd   :  { %v3135_v22 = vadd.f32 %v3134_v13, %v2892_v15  ;;  %v3136_v10 = vpop.f32.mrb[82].mxu1  ;;  %3597 = vmatpush1.bf16.msra.mxu1 %v4787_v16 }
 0x3de   :  { %v3137_v23 = vpop.f32.mrb[83].mxu1  ;;  %3598 = vmatprep.subr.bf16.mxu1 %v4792_v26  ;;  %v3141_v45 = vmax.f32 %v3133_v58, 0.0 }
 0x3df   :  { %v3142_v25 = vmax.f32 %v3135_v22, 0.0 }
 0x3e0   :  { %v3145_v29 = vpack.c.bf16 %v3141_v45, %v3141_v45 }
 0x3e1   :  { %v3146_v37 = vpack.c.bf16 %v3142_v25, %v3142_v25  ;;  %3599 = vmatpush1.bf16.msra.mxu1 %v4790_v20 }
 0x3e2   :  { %3600 = vmatprep.subr.bf16.mxu1 %v4795_v24 }
 0x3e3   :  { %3616 = vmatprep.mubr.bf16.mxu1 %v3146_v37 }
 0x3e5   :  { %3601 = vmatpush1.bf16.msra.mxu1 %v4793_v27 }
 0x3e6   :  { %3602 = vmatprep.subr.bf16.mxu1 %v4798_v28 }
 0x3e9   :  { %3603 = vmatpush1.bf16.msra.mxu1 %v4796_v42 }
 0x3ea   :  { %3604 = vmatprep.subr.bf16.mxu1 %v4801_v30 }
 0x3ed   :  { %3605 = vmatpush1.bf16.msra.mxu1 %v4799_v33 }
 0x3ee   :  { %3606 = vmatprep.subr.bf16.mxu1 %v4804_v31 }
 0x3f1   :  { %3607 = vmatpush1.bf16.msra.mxu1 %v4802_v47 }
 0x3f2   :  { %3608 = vmatprep.subr.bf16.mxu1 %v4807_v32 }
 0x3f5   :  { %3609 = vmatpush1.bf16.msra.mxu1 %v4805_v38 }
 0x3f6   :  { %3610 = vmatprep.subr.bf16.mxu1 %v4810_v35 }
 0x3f9   :  { %3611 = vmatpush1.bf16.msra.mxu1 %v4808_v51 }
 0x3fa   :  { %3612 = vmatprep.subr.bf16.mxu1 %v4813_v40 }
 0x3fd   :  { %3613 = vmatpush1.bf16.msra.mxu1 %v4811_v41 }
 0x3fe   :  { %3614 = vmatprep.subr.bf16.mxu1 %v4816_v39 }
 0x401   :  { %3615 = vmatpush1.bf16.msra.mxu1 %v4814_v44 }
 0x402   :  { %4208 = vmatprep.subr.bf16.mxu1 %v4817_v46 }
 0x404   :  { %3617 = vmatmul.mubr.bf16.vlgmr.msra.gmra.mrb[84].mxu1 %v3145_v29 }
 0x405   :  { %4209 = vmatpush3.bf16.msra.mxu1 %v4818_v48 }
 0x406   :  { %4210 = vmatprep.subr.bf16.mxu1 %v4819_v49 }
 0x409   :  { %4211 = vmatpush3.bf16.msra.mxu1 %v4820_v53 }
 0x40a   :  { %4212 = vmatprep.subr.bf16.mxu1 %v4821_v55 }
 0x40d   :  { %4213 = vmatpush3.bf16.msra.mxu1 %v4822_v56 }
 0x40e   :  { %4214 = vmatprep.subr.bf16.mxu1 %v4823_v57 }
 0x411   :  { %4215 = vmatpush3.bf16.msra.mxu1 %v4824_v59 }
 0x412   :  { %4216 = vmatprep.subr.bf16.mxu1 %v4825_v60 }
 0x415   :  { %4217 = vmatpush3.bf16.msra.mxu1 %v4826_v61 }
 0x416   :  { %4218 = vmatprep.subr.bf16.mxu1 %v4827_v8 }
 0x419   :  { %4219 = vmatpush3.bf16.msra.mxu1 %v4828_v62 }
 0x41a   :  { %4220 = vmatprep.subr.bf16.mxu1 %v4829_v63 }
 0x41d   :  { %4221 = vmatpush3.bf16.msra.mxu1 %v4830_v0 }
 0x41e   :  { %4222 = vmatprep.subr.bf16.mxu1 %v4831_v19 }
 0x421   :  { %4223 = vmatpush3.bf16.msra.mxu1 %v4832_v43 }
 0x4d7   :  { %v3618_v5 = vpop.f32.mrb[84].mxu1 }
 0x4d8   :  { %v4518_v6 = vadd.f32 %v3618_v5, %v3216_v3  ;;  %v3620_v7 = vpop.f32.mrb[85].mxu1 }
 0x4d9   :  { %v4519_v1 = vadd.f32 %v3620_v7, %v3220_v4  ;;  %v3622_v9 = vpop.f32.mrb[86].mxu1 }
 0x4da   :  { %v3625_v11 = vmax.f32 %v4518_v6, 0.0  ;;  %v3623_v12 = vpop.f32.mrb[87].mxu1 }
 0x4db   :  { %v3626_v14 = vmax.f32 %v4519_v1, 0.0 }
 0x4dc   :  { %v3627_v17 = vpack.c.bf16 %v3625_v11, %v3625_v11 }
 0x4dd   :  { %v3628_v18 = vpack.c.bf16 %v3626_v14, %v3626_v14 }
 0x4df   :  { %3796 = vmatprep.mubr.bf16.mxu1 %v3628_v18 }
 0x4e0   :  { %3797 = vmatmul.mubr.bf16.vlgmr.msra.gmra.mrb[88].mxu1 %v3627_v17 }
 0x5b3   :  { %v4224_v15 = vpop.f32.mrb[88].mxu1 }
 0x5b4   :  { %v4225_v16 = vpop.f32.mrb[89].mxu1 }
 0x5b5   :  { %v4226_v52 = vadd.f32 %v4225_v16, %v4224_v15  ;;  %v4227_v50 = vpop.f32.mrb[90].mxu1 }
 0x5b6   :  { %v4228_v26 = vpop.f32.mrb[91].mxu1 }
 0x5b7   :  { %v3799_v21 = vadd.f32 %v4226_v52, %v4055_v54 }
 0x5b9   :  { %3804 = vst [vmem:[#allocation12] sm:$0xff] %v3799_v21 }
 0x5ba   :  { %4956 = shalt.err (!%p4953_p2)
}
 0x5bb   :  { %s4957_s8 = scalar_lea.hbm %s5504_s9, 128 }
 0x5bc   :  { %p4958_p3 = scmp.ne.s32.totalorder %s5504_s9, %s4957_s8  ;;  %p4961_p4 = scmp.lt.u32.totalorder %s4957_s8, %s5504_s9 }
 0x5be   :  { %p4963_p5 = pnand %p4961_p4, %p4958_p3 }
 0x5c0   :  { %4966 = shalt.err (!%p4963_p5)
}
 0x5c1   :  { %3814 = dma.vmem_to_hbm [thread:$0]  %s3812_s0, 128, %s5504_s9, [#allocation5]  }
 0x5c2   :  { %4973 = dma.done.wait [#allocation5], 128  }
 0x5c3   :  { %4974 = vsyncadd [#allocation5], 4294967168 }
 0x5c4   :  { %3818 = vsyncpa [#allocation4], 1 }
 0x5c5   :  { %3819 = vsyncpa [#allocation7], 1 }
 0x5c6   :  { %3820 = vsyncpa [#allocation10], 1 }
 0x5c7   :  { %3821 = vsyncpa [#allocation5], 1 }

</bundles_post_ra>
